<compile_context>
chip_gen: v7x
topology: tpu7x:2x2x1
jax: 0.10.0
libtpu: 0.0.40
codegen_flags: <defaults>
</compile_context>

<pallas_src>
import functools
import math

import jax
import jax.numpy as jnp
from jax.experimental import pallas as pl
from jax.experimental.pallas import tpu as pltpu


def _round_up(x, m):
    return (x + m - 1) // m * m


def _erf_f32(x):
    # float32-accurate erf (Abramowitz & Stegun 7.1.26, |abs err| <= 1.5e-7).
    # The reciprocal goes to the EUP (approx=True) which is otherwise idle here.
    a1 = 0.254829592
    a2 = -0.284496736
    a3 = 1.421413741
    a4 = -1.453152027
    a5 = 1.061405429
    p = 0.3275911
    s = jnp.where(x >= 0.0, 1.0, -1.0)
    ax = jnp.abs(x)
    t = pl.reciprocal(1.0 + p * ax, approx=True)
    poly = ((((a5 * t + a4) * t + a3) * t + a2) * t + a1) * t
    return s * (1.0 - poly * jnp.exp(-ax * ax))


def _gelu_exact(x):
    # PyTorch nn.GELU() default = exact (erf-based) GELU.
    return 0.5 * x * (1.0 + _erf_f32(x * (1.0 / math.sqrt(2.0))))


def mlp_kernel(x_ref, w1_ref, b1_ref, dww_ref, dwb_ref, w2_ref, b2_ref, o_ref,
               *, tile_h):
    # x_ref:   (1, H, W, Cin)   bf16  full image (resident across the t axis)
    # w1_ref:  (Cin, Chid)      bf16  fc1 weights (1x1 conv as matmul)
    # b1_ref:  (1, Chid)        f32
    # dww_ref: (3, 3, Chid)     f32   depthwise 3x3 weights
    # dwb_ref: (1, Chid)        f32
    # w2_ref:  (Chid, Cout)     bf16  fc2 weights
    # b2_ref:  (1, Cout)        f32
    # o_ref:   (1, TH, W, Cout) f32   one row tile of the output
    _, H, W, Cin = x_ref.shape
    Chid = w1_ref.shape[1]
    Cout = w2_ref.shape[1]
    TH = tile_h
    M = TH * W            # pixels in this tile (flattened rows*W layout)
    MP = (TH + 2) * W     # pixels including the two halo rows

    t = pl.program_id(1)
    nt = pl.num_programs(1)

    w1 = w1_ref[...]
    b1 = b1_ref[...]

    # --- fc1 (1x1 conv) for the TH main rows: one MXU matmul, f32 accumulate ---
    row0 = pl.multiple_of(t * TH, TH)
    xs = x_ref[0, pl.ds(row0, TH), :, :].reshape(M, Cin)               # bf16
    h_mid = jnp.dot(xs, w1, preferred_element_type=jnp.float32) + b1   # (M, Chid)

    # --- fc1 recomputed for the 2 halo rows; masked to zero at image borders ---
    top_ok = (t > 0).astype(jnp.float32)
    bot_ok = (t < nt - 1).astype(jnp.float32)
    rt = jnp.maximum(row0 - 1, 0)
    rb = jnp.minimum(row0 + TH, H - 1)
    xt = x_ref[0, pl.ds(rt, 1), :, :].reshape(W, Cin)
    xb = x_ref[0, pl.ds(rb, 1), :, :].reshape(W, Cin)
    h_top = (jnp.dot(xt, w1, preferred_element_type=jnp.float32) + b1) * top_ok
    h_bot = (jnp.dot(xb, w1, preferred_element_type=jnp.float32) + b1) * bot_ok

    # Padded-in-H hidden tensor, flattened: row k <-> (padded row k//W, col k%W).
    # Pieces have 8-aligned sublane extents (W, M, W), so this concat is a cheap
    # aligned placement — no (H+2, W+2, Chid) buffer is ever materialized.
    hp = jnp.concatenate([h_top, h_mid, h_bot], axis=0)                # (MP, Chid)

    # --- W-direction (+/-1) taps: two shifted copies + border mask ---
    col = jax.lax.broadcasted_iota(jnp.int32, (MP, 1), 0) % W
    left_ok = (col >= 1).astype(jnp.float32)        # x-1 exists
    right_ok = (col <= W - 2).astype(jnp.float32)   # x+1 exists
    zrow = jnp.zeros((1, Chid), jnp.float32)
    hl = jnp.concatenate([zrow, hp[:-1]], axis=0) * left_ok    # value at (row, x-1)
    hr = jnp.concatenate([hp[1:], zrow], axis=0) * right_ok    # value at (row, x+1)

    # --- depthwise 3x3 accumulation (f32 on the VPU); vertical taps are
    #     8-aligned sublane slices of hp/hl/hr (no copies) ---
    dww = dww_ref[...]                                          # (3, 3, Chid)
    acc = jnp.broadcast_to(dwb_ref[...], (M, Chid))
    for ky in range(3):
        o = ky * W
        acc = acc + (hl[o:o + M] * dww[ky, 0]
                     + hp[o:o + M] * dww[ky, 1]
                     + hr[o:o + M] * dww[ky, 2])

    # --- GELU (exact, erf-based); dropout(p=0.0) is identity ---
    g = _gelu_exact(acc)

    # --- fc2 (1x1 conv): bf16 MXU matmul, f32 accumulate ---
    out = jnp.dot(g.astype(jnp.bfloat16), w2_ref[...],
                  preferred_element_type=jnp.float32) + b2_ref[...]
    o_ref[0] = out.reshape(TH, W, Cout).astype(o_ref.dtype)


def mlp_forward_nhwc(x_nhwc, params, *, tile_h=8, interpret=False):
    """x_nhwc: (B, H, W, Cin) float32. Returns (B, H, W, Cout) float32."""
    w1, b1, dww, dwb, w2, b2 = params
    B, H, W, Cin = x_nhwc.shape
    Chid = w1.shape[1]
    Cout = w2.shape[1]

    TH = tile_h if (H % tile_h == 0) else H
    T = H // TH

    # Lane-dense channel dims: zero-pad all channel axes to multiples of 128.
    Cin_p = _round_up(Cin, 128)
    Chid_p = _round_up(Chid, 128)
    Cout_p = _round_up(Cout, 128)

    xp = jnp.pad(x_nhwc, ((0, 0), (0, 0), (0, 0), (0, Cin_p - Cin))
                 ).astype(jnp.bfloat16)
    w1p = jnp.pad(w1, ((0, Cin_p - Cin), (0, Chid_p - Chid))).astype(jnp.bfloat16)
    b1p = jnp.pad(b1, ((0, 0), (0, Chid_p - Chid))).astype(jnp.float32)
    dwwp = jnp.pad(dww, ((0, 0), (0, 0), (0, Chid_p - Chid))).astype(jnp.float32)
    dwbp = jnp.pad(dwb, ((0, 0), (0, Chid_p - Chid))).astype(jnp.float32)
    w2p = jnp.pad(w2, ((0, Chid_p - Chid), (0, Cout_p - Cout))).astype(jnp.bfloat16)
    b2p = jnp.pad(b2, ((0, 0), (0, Cout_p - Cout))).astype(jnp.float32)

    kernel = functools.partial(mlp_kernel, tile_h=TH)

    flops = (2 * B * H * W * (Cin_p * Chid_p + Chid_p * Cout_p)
             + 18 * B * H * W * Chid_p)
    transcendentals = 2 * B * H * W * Chid_p
    bytes_accessed = (xp.size * 2 + B * H * W * Cout_p * 4
                      + w1p.size * 2 + w2p.size * 2
                      + (b1p.size + dwwp.size + dwbp.size + b2p.size) * 4)

    out = pl.pallas_call(
        kernel,
        out_shape=jax.ShapeDtypeStruct((B, H, W, Cout_p), jnp.float32),
        grid_spec=pltpu.PrefetchScalarGridSpec(
            num_scalar_prefetch=0,
            grid=(B, T),
            in_specs=[
                # Full image per b; constant across t so it is fetched once per b.
                pl.BlockSpec((1, H, W, Cin_p), lambda b, t: (b, 0, 0, 0)),
                pl.BlockSpec((Cin_p, Chid_p), lambda b, t: (0, 0)),
                pl.BlockSpec((1, Chid_p), lambda b, t: (0, 0)),
                pl.BlockSpec((3, 3, Chid_p), lambda b, t: (0, 0, 0)),
                pl.BlockSpec((1, Chid_p), lambda b, t: (0, 0)),
                pl.BlockSpec((Chid_p, Cout_p), lambda b, t: (0, 0)),
                pl.BlockSpec((1, Cout_p), lambda b, t: (0, 0)),
            ],
            out_specs=pl.BlockSpec((1, TH, W, Cout_p),
                                   lambda b, t: (b, t, 0, 0)),
        ),
        compiler_params=pltpu.CompilerParams(
            dimension_semantics=("parallel", "parallel"),
            vmem_limit_bytes=48 * 1024 * 1024,
        ),
        cost_estimate=pl.CostEstimate(
            flops=flops,
            transcendentals=transcendentals,
            bytes_accessed=bytes_accessed,
        ),
        interpret=interpret,
    )(xp, w1p, b1p, dwwp, dwbp, w2p, b2p)

    return out[..., :Cout]


def mlp_forward(x_nchw, params, *, tile_h=8):
    """NCHW wrapper matching the PyTorch Conv2d interface."""
    # TODO(synk): the NCHW<->NHWC transposes are kept only to match the PyTorch
    # interface; when embedded in an NHWC JAX model, call mlp_forward_nhwc
    # directly and skip these two HBM round trips.
    x = jnp.transpose(x_nchw, (0, 2, 3, 1))
    y = mlp_forward_nhwc(x, params, tile_h=tile_h)
    return jnp.transpose(y, (0, 3, 1, 2))


def init_params(key, in_features, hidden_features=None, out_features=None):
    """Deterministic init matching Mlp._init_weights semantics:
    Conv2d weight ~ N(0, sqrt(2 / fan_out)), bias = 0."""
    out_features = out_features or in_features
    hidden_features = hidden_features or in_features
    k1, k2, k3 = jax.random.split(key, 3)

    std_fc1 = math.sqrt(2.0 / hidden_features)   # 1*1*hidden / 1
    std_dw = math.sqrt(2.0 / 9.0)                # 3*3*hidden / hidden
    std_fc2 = math.sqrt(2.0 / out_features)      # 1*1*out / 1

    w1 = std_fc1 * jax.random.normal(k1, (in_features, hidden_features), jnp.float32)
    b1 = jnp.zeros((1, hidden_features), jnp.float32)
    dww = std_dw * jax.random.normal(k2, (3, 3, hidden_features), jnp.float32)
    dwb = jnp.zeros((1, hidden_features), jnp.float32)
    w2 = std_fc2 * jax.random.normal(k3, (hidden_features, out_features), jnp.float32)
    b2 = jnp.zeros((1, out_features), jnp.float32)
    return (w1, b1, dww, dwb, w2, b2)


def mlp_reference(x_nchw, params):
    """Pure-JAX f32 reference (matches the PyTorch forward)."""
    w1, b1, dww, dwb, w2, b2 = params
    x = jnp.transpose(x_nchw, (0, 2, 3, 1)).astype(jnp.float32)
    B, H, W, _ = x.shape
    h = jnp.einsum('bhwc,cd->bhwd', x, w1) + b1.reshape(1, 1, 1, -1)
    hp = jnp.pad(h, ((0, 0), (1, 1), (1, 1), (0, 0)))
    acc = jnp.broadcast_to(dwb.reshape(1, 1, 1, -1), h.shape)
    for ky in range(3):
        for kx in range(3):
            acc = acc + hp[:, ky:ky + H, kx:kx + W, :] * dww[ky, kx]
    g = 0.5 * acc * (1.0 + jax.scipy.special.erf(acc / jnp.sqrt(2.0)))
    out = jnp.einsum('bhwc,cd->bhwd', g, w2) + b2.reshape(1, 1, 1, -1)
    return jnp.transpose(out, (0, 3, 1, 2))


if __name__ == "__main__":
    B, Cin, H, W = 2, 4, 16, 16
    hidden = 32
    key = jax.random.PRNGKey(0)
    kx, kp = jax.random.split(key)

    x = jax.random.normal(kx, (B, Cin, H, W), jnp.float32)
    params = init_params(kp, in_features=Cin, hidden_features=hidden)

    y = mlp_forward(x, params, tile_h=8)
    jax.block_until_ready(y)
    assert y.shape == (B, Cin, H, W) and y.dtype == jnp.float32

    # Loose tolerance: bf16 matmul operands (f32 accumulation) vs f32 reference.
    y_ref = mlp_reference(x, params)
    err = float(jnp.max(jnp.abs(y - y_ref)))
    assert err < 0.35, f"max abs error too large: {err}"
    print("KERNEL_OK")
</pallas_src>

<mosaic_0001>
module attributes {stable_mosaic.version = 11 : i64} {
  func.func @mlp_kernel(%arg0: i32, %arg1: i32, %arg2: memref<1x16x16x128xbf16, #tpu.memory_space<vmem>>, %arg3: memref<128x128xbf16, #tpu.memory_space<vmem>>, %arg4: memref<1x128xf32, #tpu.memory_space<vmem>>, %arg5: memref<3x3x128xf32, #tpu.memory_space<vmem>>, %arg6: memref<1x128xf32, #tpu.memory_space<vmem>>, %arg7: memref<128x128xbf16, #tpu.memory_space<vmem>>, %arg8: memref<1x128xf32, #tpu.memory_space<vmem>>, %arg9: memref<1x8x16x128xf32, #tpu.memory_space<vmem>>) attributes {dimension_semantics = [#tpu.dimension_semantics<parallel>, #tpu.dimension_semantics<parallel>], iteration_bounds = array<i64: 2, 2>, scalar_prefetch = 0 : i64, scratch_operands = 0 : i64, tpu.core_type = #tpu.core_type<tc>, window_params = [{transform_indices = @transform_0, window_bounds = array<i64: 1, 16, 16, 128>}, {pipeline_mode = #tpu.pipeline_mode<synchronous>, transform_indices = @transform_1, window_bounds = array<i64: 128, 128>}, {pipeline_mode = #tpu.pipeline_mode<synchronous>, transform_indices = @transform_2, window_bounds = array<i64: 1, 128>}, {pipeline_mode = #tpu.pipeline_mode<synchronous>, transform_indices = @transform_3, window_bounds = array<i64: 3, 3, 128>}, {pipeline_mode = #tpu.pipeline_mode<synchronous>, transform_indices = @transform_4, window_bounds = array<i64: 1, 128>}, {pipeline_mode = #tpu.pipeline_mode<synchronous>, transform_indices = @transform_5, window_bounds = array<i64: 128, 128>}, {pipeline_mode = #tpu.pipeline_mode<synchronous>, transform_indices = @transform_6, window_bounds = array<i64: 1, 128>}, {transform_indices = @transform_7, window_bounds = array<i64: 1, 8, 16, 128>}]} {
    %c0 = arith.constant 0 : index
    %c0_0 = arith.constant 0 : index
    %0 = vector.load %arg3[%c0, %c0_0] : memref<128x128xbf16, #tpu.memory_space<vmem>>, vector<128x128xbf16>
    %c0_1 = arith.constant 0 : index
    %c0_2 = arith.constant 0 : index
    %1 = vector.load %arg4[%c0_1, %c0_2] : memref<1x128xf32, #tpu.memory_space<vmem>>, vector<1x128xf32>
    %c8_i32 = arith.constant 8 : i32
    %2 = arith.muli %arg1, %c8_i32 : i32
    %3 = tpu.assume_multiple %2, 8 : i32
    %c0_3 = arith.constant 0 : index
    %4 = arith.index_cast %3 : i32 to index
    %c0_4 = arith.constant 0 : index
    %c0_5 = arith.constant 0 : index
    %5 = vector.load %arg2[%c0_3, %4, %c0_4, %c0_5] : memref<1x16x16x128xbf16, #tpu.memory_space<vmem>>, vector<1x8x16x128xbf16>
    %6 = vector.shape_cast %5 : vector<1x8x16x128xbf16> to vector<8x16x128xbf16>
    %7 = vector.shape_cast %6 : vector<8x16x128xbf16> to vector<128x128xbf16>
    %cst = arith.constant dense<0.000000e+00> : vector<128x128xf32>
    %8 = tpu.matmul %7, %0, %cst {dimension_numbers = #tpu.dot_dimension_numbers<[1], [0], [0], [1], [0, 0, 1, 1], [], []>} : vector<128x128xbf16>, vector<128x128xbf16>, vector<128x128xf32> -> vector<128x128xf32>
    %9 = vector.broadcast %1 : vector<1x128xf32> to vector<128x128xf32>
    %10 = arith.addf %8, %9 : vector<128x128xf32>
    %c0_i32 = arith.constant 0 : i32
    %11 = arith.cmpi sgt, %arg1, %c0_i32 : i32
    %12 = arith.extui %11 : i1 to i32
    %13 = arith.sitofp %12 : i32 to f32
    %c1_i32 = arith.constant 1 : i32
    %14 = arith.cmpi slt, %arg1, %c1_i32 : i32
    %15 = arith.extui %14 : i1 to i32
    %16 = arith.sitofp %15 : i32 to f32
    %c1_i32_6 = arith.constant 1 : i32
    %17 = arith.subi %3, %c1_i32_6 : i32
    %c0_i32_7 = arith.constant 0 : i32
    %18 = arith.maxsi %17, %c0_i32_7 : i32
    %c8_i32_8 = arith.constant 8 : i32
    %19 = arith.addi %3, %c8_i32_8 : i32
    %c15_i32 = arith.constant 15 : i32
    %20 = arith.minsi %19, %c15_i32 : i32
    %c0_9 = arith.constant 0 : index
    %21 = arith.index_cast %18 : i32 to index
    %c0_10 = arith.constant 0 : index
    %c0_11 = arith.constant 0 : index
    %22 = vector.load %arg2[%c0_9, %21, %c0_10, %c0_11] : memref<1x16x16x128xbf16, #tpu.memory_space<vmem>>, vector<1x1x16x128xbf16>
    %23 = vector.shape_cast %22 : vector<1x1x16x128xbf16> to vector<1x16x128xbf16>
    %24 = vector.shape_cast %23 : vector<1x16x128xbf16> to vector<16x128xbf16>
    %c0_12 = arith.constant 0 : index
    %25 = arith.index_cast %20 : i32 to index
    %c0_13 = arith.constant 0 : index
    %c0_14 = arith.constant 0 : index
    %26 = vector.load %arg2[%c0_12, %25, %c0_13, %c0_14] : memref<1x16x16x128xbf16, #tpu.memory_space<vmem>>, vector<1x1x16x128xbf16>
    %27 = vector.shape_cast %26 : vector<1x1x16x128xbf16> to vector<1x16x128xbf16>
    %28 = vector.shape_cast %27 : vector<1x16x128xbf16> to vector<16x128xbf16>
    %cst_15 = arith.constant dense<0.000000e+00> : vector<16x128xf32>
    %29 = tpu.matmul %24, %0, %cst_15 {dimension_numbers = #tpu.dot_dimension_numbers<[1], [0], [0], [1], [0, 0, 1, 1], [], []>} : vector<16x128xbf16>, vector<128x128xbf16>, vector<16x128xf32> -> vector<16x128xf32>
    %30 = vector.broadcast %1 : vector<1x128xf32> to vector<16x128xf32>
    %31 = arith.addf %29, %30 : vector<16x128xf32>
    %32 = vector.broadcast %13 : f32 to vector<16x128xf32>
    %33 = arith.mulf %31, %32 : vector<16x128xf32>
    %cst_16 = arith.constant dense<0.000000e+00> : vector<16x128xf32>
    %34 = tpu.matmul %28, %0, %cst_16 {dimension_numbers = #tpu.dot_dimension_numbers<[1], [0], [0], [1], [0, 0, 1, 1], [], []>} : vector<16x128xbf16>, vector<128x128xbf16>, vector<16x128xf32> -> vector<16x128xf32>
    %35 = vector.broadcast %1 : vector<1x128xf32> to vector<16x128xf32>
    %36 = arith.addf %34, %35 : vector<16x128xf32>
    %37 = vector.broadcast %16 : f32 to vector<16x128xf32>
    %38 = arith.mulf %36, %37 : vector<16x128xf32>
    %39 = tpu.concatenate %33, %10, %38 in 0 : vector<16x128xf32>, vector<128x128xf32>, vector<16x128xf32> -> vector<160x128xf32>
    %40 = tpu.iota {dimensions = array<i32: 0>} : vector<160x1xi32>
    %c16_i32 = arith.constant 16 : i32
    %c0_i32_17 = arith.constant 0 : i32
    %41 = arith.cmpi eq, %c16_i32, %c0_i32_17 : i32
    %c1_i32_18 = arith.constant 1 : i32
    %42 = arith.select %41, %c1_i32_18, %c16_i32 : i32
    %43 = vector.broadcast %42 : i32 to vector<160x1xi32>
    %44 = arith.remsi %40, %43 : vector<160x1xi32>
    %c0_i32_19 = arith.constant 0 : i32
    %45 = vector.broadcast %c0_i32_19 : i32 to vector<160x1xi32>
    %46 = arith.cmpi ne, %44, %45 : vector<160x1xi32>
    %c0_i32_20 = arith.constant 0 : i32
    %47 = vector.broadcast %c0_i32_20 : i32 to vector<160x1xi32>
    %48 = arith.cmpi slt, %44, %47 : vector<160x1xi32>
    %c0_i32_21 = arith.constant 0 : i32
    %49 = arith.cmpi slt, %42, %c0_i32_21 : i32
    %50 = vector.broadcast %49 : i1 to vector<160x1xi1>
    %51 = vector.broadcast %50 : vector<160x1xi1> to vector<160x1xi1>
    %52 = arith.xori %48, %51 : vector<160x1xi1>
    %53 = arith.andi %52, %46 : vector<160x1xi1>
    %54 = vector.broadcast %42 : i32 to vector<160x1xi32>
    %55 = arith.addi %44, %54 : vector<160x1xi32>
    %56 = arith.select %53, %55, %44 : vector<160x1xi1>, vector<160x1xi32>
    %c1_i32_22 = arith.constant 1 : i32
    %57 = vector.broadcast %c1_i32_22 : i32 to vector<160x1xi32>
    %58 = arith.cmpi sge, %56, %57 : vector<160x1xi32>
    %59 = arith.extui %58 : vector<160x1xi1> to vector<160x1xi32>
    %60 = arith.sitofp %59 : vector<160x1xi32> to vector<160x1xf32>
    %c14_i32 = arith.constant 14 : i32
    %61 = vector.broadcast %c14_i32 : i32 to vector<160x1xi32>
    %62 = arith.cmpi sle, %56, %61 : vector<160x1xi32>
    %63 = arith.extui %62 : vector<160x1xi1> to vector<160x1xi32>
    %64 = arith.sitofp %63 : vector<160x1xi32> to vector<160x1xf32>
    %cst_23 = arith.constant 0.000000e+00 : f32
    %65 = vector.broadcast %cst_23 : f32 to vector<1x128xf32>
    %66 = vector.extract_strided_slice %39 {offsets = [0, 0], sizes = [159, 128], strides = [1, 1]} : vector<160x128xf32> to vector<159x128xf32>
    %67 = tpu.concatenate %65, %66 in 0 : vector<1x128xf32>, vector<159x128xf32> -> vector<160x128xf32>
    %68 = vector.broadcast %60 : vector<160x1xf32> to vector<160x128xf32>
    %69 = arith.mulf %67, %68 : vector<160x128xf32>
    %70 = vector.extract_strided_slice %39 {offsets = [1, 0], sizes = [159, 128], strides = [1, 1]} : vector<160x128xf32> to vector<159x128xf32>
    %71 = tpu.concatenate %70, %65 in 0 : vector<159x128xf32>, vector<1x128xf32> -> vector<160x128xf32>
    %72 = vector.broadcast %64 : vector<160x1xf32> to vector<160x128xf32>
    %73 = arith.mulf %71, %72 : vector<160x128xf32>
    %c0_24 = arith.constant 0 : index
    %c0_25 = arith.constant 0 : index
    %c0_26 = arith.constant 0 : index
    %74 = vector.load %arg5[%c0_24, %c0_25, %c0_26] : memref<3x3x128xf32, #tpu.memory_space<vmem>>, vector<3x3x128xf32>
    %c0_27 = arith.constant 0 : index
    %c0_28 = arith.constant 0 : index
    %75 = vector.load %arg6[%c0_27, %c0_28] : memref<1x128xf32, #tpu.memory_space<vmem>>, vector<1x128xf32>
    %76 = vector.shape_cast %75 : vector<1x128xf32> to vector<1x128xf32>
    %77 = vector.broadcast %76 : vector<1x128xf32> to vector<128x128xf32>
    %78 = vector.extract_strided_slice %69 {offsets = [0, 0], sizes = [128, 128], strides = [1, 1]} : vector<160x128xf32> to vector<128x128xf32>
    %79 = vector.extract_strided_slice %74 {offsets = [0, 0, 0], sizes = [1, 1, 128], strides = [1, 1, 1]} : vector<3x3x128xf32> to vector<1x1x128xf32>
    %80 = vector.shape_cast %79 : vector<1x1x128xf32> to vector<128xf32>
    %81 = vector.shape_cast %80 : vector<128xf32> to vector<1x128xf32>
    %82 = vector.broadcast %81 : vector<1x128xf32> to vector<128x128xf32>
    %83 = arith.mulf %78, %82 : vector<128x128xf32>
    %84 = vector.extract_strided_slice %39 {offsets = [0, 0], sizes = [128, 128], strides = [1, 1]} : vector<160x128xf32> to vector<128x128xf32>
    %85 = vector.extract_strided_slice %74 {offsets = [0, 1, 0], sizes = [1, 1, 128], strides = [1, 1, 1]} : vector<3x3x128xf32> to vector<1x1x128xf32>
    %86 = vector.shape_cast %85 : vector<1x1x128xf32> to vector<128xf32>
    %87 = vector.shape_cast %86 : vector<128xf32> to vector<1x128xf32>
    %88 = vector.broadcast %87 : vector<1x128xf32> to vector<128x128xf32>
    %89 = arith.mulf %84, %88 : vector<128x128xf32>
    %90 = arith.addf %83, %89 : vector<128x128xf32>
    %91 = vector.extract_strided_slice %73 {offsets = [0, 0], sizes = [128, 128], strides = [1, 1]} : vector<160x128xf32> to vector<128x128xf32>
    %92 = vector.extract_strided_slice %74 {offsets = [0, 2, 0], sizes = [1, 1, 128], strides = [1, 1, 1]} : vector<3x3x128xf32> to vector<1x1x128xf32>
    %93 = vector.shape_cast %92 : vector<1x1x128xf32> to vector<128xf32>
    %94 = vector.shape_cast %93 : vector<128xf32> to vector<1x128xf32>
    %95 = vector.broadcast %94 : vector<1x128xf32> to vector<128x128xf32>
    %96 = arith.mulf %91, %95 : vector<128x128xf32>
    %97 = arith.addf %90, %96 : vector<128x128xf32>
    %98 = arith.addf %77, %97 : vector<128x128xf32>
    %99 = vector.extract_strided_slice %69 {offsets = [16, 0], sizes = [128, 128], strides = [1, 1]} : vector<160x128xf32> to vector<128x128xf32>
    %100 = vector.extract_strided_slice %74 {offsets = [1, 0, 0], sizes = [1, 1, 128], strides = [1, 1, 1]} : vector<3x3x128xf32> to vector<1x1x128xf32>
    %101 = vector.shape_cast %100 : vector<1x1x128xf32> to vector<128xf32>
    %102 = vector.shape_cast %101 : vector<128xf32> to vector<1x128xf32>
    %103 = vector.broadcast %102 : vector<1x128xf32> to vector<128x128xf32>
    %104 = arith.mulf %99, %103 : vector<128x128xf32>
    %105 = vector.extract_strided_slice %39 {offsets = [16, 0], sizes = [128, 128], strides = [1, 1]} : vector<160x128xf32> to vector<128x128xf32>
    %106 = vector.extract_strided_slice %74 {offsets = [1, 1, 0], sizes = [1, 1, 128], strides = [1, 1, 1]} : vector<3x3x128xf32> to vector<1x1x128xf32>
    %107 = vector.shape_cast %106 : vector<1x1x128xf32> to vector<128xf32>
    %108 = vector.shape_cast %107 : vector<128xf32> to vector<1x128xf32>
    %109 = vector.broadcast %108 : vector<1x128xf32> to vector<128x128xf32>
    %110 = arith.mulf %105, %109 : vector<128x128xf32>
    %111 = arith.addf %104, %110 : vector<128x128xf32>
    %112 = vector.extract_strided_slice %73 {offsets = [16, 0], sizes = [128, 128], strides = [1, 1]} : vector<160x128xf32> to vector<128x128xf32>
    %113 = vector.extract_strided_slice %74 {offsets = [1, 2, 0], sizes = [1, 1, 128], strides = [1, 1, 1]} : vector<3x3x128xf32> to vector<1x1x128xf32>
    %114 = vector.shape_cast %113 : vector<1x1x128xf32> to vector<128xf32>
    %115 = vector.shape_cast %114 : vector<128xf32> to vector<1x128xf32>
    %116 = vector.broadcast %115 : vector<1x128xf32> to vector<128x128xf32>
    %117 = arith.mulf %112, %116 : vector<128x128xf32>
    %118 = arith.addf %111, %117 : vector<128x128xf32>
    %119 = arith.addf %98, %118 : vector<128x128xf32>
    %120 = vector.extract_strided_slice %69 {offsets = [32, 0], sizes = [128, 128], strides = [1, 1]} : vector<160x128xf32> to vector<128x128xf32>
    %121 = vector.extract_strided_slice %74 {offsets = [2, 0, 0], sizes = [1, 1, 128], strides = [1, 1, 1]} : vector<3x3x128xf32> to vector<1x1x128xf32>
    %122 = vector.shape_cast %121 : vector<1x1x128xf32> to vector<128xf32>
    %123 = vector.shape_cast %122 : vector<128xf32> to vector<1x128xf32>
    %124 = vector.broadcast %123 : vector<1x128xf32> to vector<128x128xf32>
    %125 = arith.mulf %120, %124 : vector<128x128xf32>
    %126 = vector.extract_strided_slice %39 {offsets = [32, 0], sizes = [128, 128], strides = [1, 1]} : vector<160x128xf32> to vector<128x128xf32>
    %127 = vector.extract_strided_slice %74 {offsets = [2, 1, 0], sizes = [1, 1, 128], strides = [1, 1, 1]} : vector<3x3x128xf32> to vector<1x1x128xf32>
    %128 = vector.shape_cast %127 : vector<1x1x128xf32> to vector<128xf32>
    %129 = vector.shape_cast %128 : vector<128xf32> to vector<1x128xf32>
    %130 = vector.broadcast %129 : vector<1x128xf32> to vector<128x128xf32>
    %131 = arith.mulf %126, %130 : vector<128x128xf32>
    %132 = arith.addf %125, %131 : vector<128x128xf32>
    %133 = vector.extract_strided_slice %73 {offsets = [32, 0], sizes = [128, 128], strides = [1, 1]} : vector<160x128xf32> to vector<128x128xf32>
    %134 = vector.extract_strided_slice %74 {offsets = [2, 2, 0], sizes = [1, 1, 128], strides = [1, 1, 1]} : vector<3x3x128xf32> to vector<1x1x128xf32>
    %135 = vector.shape_cast %134 : vector<1x1x128xf32> to vector<128xf32>
    %136 = vector.shape_cast %135 : vector<128xf32> to vector<1x128xf32>
    %137 = vector.broadcast %136 : vector<1x128xf32> to vector<128x128xf32>
    %138 = arith.mulf %133, %137 : vector<128x128xf32>
    %139 = arith.addf %132, %138 : vector<128x128xf32>
    %140 = arith.addf %119, %139 : vector<128x128xf32>
    %cst_29 = arith.constant 5.000000e-01 : f32
    %141 = vector.broadcast %cst_29 : f32 to vector<128x128xf32>
    %142 = arith.mulf %141, %140 : vector<128x128xf32>
    %cst_30 = arith.constant 0.707106769 : f32
    %143 = vector.broadcast %cst_30 : f32 to vector<128x128xf32>
    %144 = arith.mulf %140, %143 : vector<128x128xf32>
    %cst_31 = arith.constant 0.000000e+00 : f32
    %145 = vector.broadcast %cst_31 : f32 to vector<128x128xf32>
    %146 = arith.cmpf oge, %144, %145 : vector<128x128xf32>
    %cst_32 = arith.constant 1.000000e+00 : f32
    %cst_33 = arith.constant -1.000000e+00 : f32
    %147 = vector.broadcast %cst_32 : f32 to vector<128x128xf32>
    %148 = vector.broadcast %cst_33 : f32 to vector<128x128xf32>
    %149 = arith.select %146, %147, %148 : vector<128x128xi1>, vector<128x128xf32>
    %150 = math.absf %144 : vector<128x128xf32>
    %cst_34 = arith.constant 0.327591091 : f32
    %151 = vector.broadcast %cst_34 : f32 to vector<128x128xf32>
    %152 = arith.mulf %151, %150 : vector<128x128xf32>
    %cst_35 = arith.constant 1.000000e+00 : f32
    %153 = vector.broadcast %cst_35 : f32 to vector<128x128xf32>
    %154 = arith.addf %153, %152 : vector<128x128xf32>
    %155 = tpu.reciprocal %154 {approx = true} : vector<128x128xf32> -> vector<128x128xf32>
    %cst_36 = arith.constant 1.06140542 : f32
    %156 = vector.broadcast %cst_36 : f32 to vector<128x128xf32>
    %157 = arith.mulf %156, %155 : vector<128x128xf32>
    %cst_37 = arith.constant -1.45315206 : f32
    %158 = vector.broadcast %cst_37 : f32 to vector<128x128xf32>
    %159 = arith.addf %157, %158 : vector<128x128xf32>
    %160 = arith.mulf %159, %155 : vector<128x128xf32>
    %cst_38 = arith.constant 1.42141378 : f32
    %161 = vector.broadcast %cst_38 : f32 to vector<128x128xf32>
    %162 = arith.addf %160, %161 : vector<128x128xf32>
    %163 = arith.mulf %162, %155 : vector<128x128xf32>
    %cst_39 = arith.constant -0.284496725 : f32
    %164 = vector.broadcast %cst_39 : f32 to vector<128x128xf32>
    %165 = arith.addf %163, %164 : vector<128x128xf32>
    %166 = arith.mulf %165, %155 : vector<128x128xf32>
    %cst_40 = arith.constant 0.254829586 : f32
    %167 = vector.broadcast %cst_40 : f32 to vector<128x128xf32>
    %168 = arith.addf %166, %167 : vector<128x128xf32>
    %169 = arith.mulf %168, %155 : vector<128x128xf32>
    %cst_41 = arith.constant 0.000000e+00 : f32
    %170 = vector.broadcast %cst_41 : f32 to vector<128x128xf32>
    %171 = arith.subf %170, %150 : vector<128x128xf32>
    %172 = arith.mulf %171, %150 : vector<128x128xf32>
    %173 = math.exp %172 : vector<128x128xf32>
    %174 = arith.mulf %169, %173 : vector<128x128xf32>
    %cst_42 = arith.constant 1.000000e+00 : f32
    %175 = vector.broadcast %cst_42 : f32 to vector<128x128xf32>
    %176 = arith.subf %175, %174 : vector<128x128xf32>
    %177 = arith.mulf %149, %176 : vector<128x128xf32>
    %cst_43 = arith.constant 1.000000e+00 : f32
    %178 = vector.broadcast %cst_43 : f32 to vector<128x128xf32>
    %179 = arith.addf %178, %177 : vector<128x128xf32>
    %180 = arith.mulf %142, %179 : vector<128x128xf32>
    %181 = arith.truncf %180 : vector<128x128xf32> to vector<128x128xbf16>
    %c0_44 = arith.constant 0 : index
    %c0_45 = arith.constant 0 : index
    %182 = vector.load %arg7[%c0_44, %c0_45] : memref<128x128xbf16, #tpu.memory_space<vmem>>, vector<128x128xbf16>
    %cst_46 = arith.constant dense<0.000000e+00> : vector<128x128xf32>
    %183 = tpu.matmul %181, %182, %cst_46 {dimension_numbers = #tpu.dot_dimension_numbers<[1], [0], [0], [1], [0, 0, 1, 1], [], []>} : vector<128x128xbf16>, vector<128x128xbf16>, vector<128x128xf32> -> vector<128x128xf32>
    %c0_47 = arith.constant 0 : index
    %c0_48 = arith.constant 0 : index
    %184 = vector.load %arg8[%c0_47, %c0_48] : memref<1x128xf32, #tpu.memory_space<vmem>>, vector<1x128xf32>
    %185 = vector.broadcast %184 : vector<1x128xf32> to vector<128x128xf32>
    %186 = arith.addf %183, %185 : vector<128x128xf32>
    %187 = vector.shape_cast %186 : vector<128x128xf32> to vector<8x16x128xf32>
    %c0_49 = arith.constant 0 : index
    %c0_50 = arith.constant 0 : index
    %c0_51 = arith.constant 0 : index
    %c0_52 = arith.constant 0 : index
    %188 = vector.load %arg9[%c0_49, %c0_50, %c0_51, %c0_52] : memref<1x8x16x128xf32, #tpu.memory_space<vmem>>, vector<1x8x16x128xf32>
    %189 = vector.shape_cast %188 : vector<1x8x16x128xf32> to vector<8x16x128xf32>
    %190 = vector.shape_cast %187 : vector<8x16x128xf32> to vector<1x8x16x128xf32>
    tpu.vector_store %arg9[%c0_49, %c0_50, %c0_51, %c0_52], %190 {strides = array<i32>} : memref<1x8x16x128xf32, #tpu.memory_space<vmem>>, vector<1x8x16x128xf32>,
    return
  }
  func.func @transform_0(%arg0: i32, %arg1: i32) -> (i32, i32, i32, i32) {
    %c0_i32 = arith.constant 0 : i32
    %c0_i32_0 = arith.constant 0 : i32
    %c0_i32_1 = arith.constant 0 : i32
    %c0_i32_2 = arith.constant 0 : i32
    return %arg0, %c0_i32, %c0_i32_0, %c0_i32_1 : i32, i32, i32, i32
  }
  func.func @transform_1(%arg0: i32, %arg1: i32) -> (i32, i32) {
    %c0_i32 = arith.constant 0 : i32
    %c0_i32_0 = arith.constant 0 : i32
    %c0_i32_1 = arith.constant 0 : i32
    return %c0_i32, %c0_i32_0 : i32, i32
  }
  func.func @transform_2(%arg0: i32, %arg1: i32) -> (i32, i32) {
    %c0_i32 = arith.constant 0 : i32
    %c0_i32_0 = arith.constant 0 : i32
    %c0_i32_1 = arith.constant 0 : i32
    return %c0_i32, %c0_i32_0 : i32, i32
  }
  func.func @transform_3(%arg0: i32, %arg1: i32) -> (i32, i32, i32) {
    %c0_i32 = arith.constant 0 : i32
    %c0_i32_0 = arith.constant 0 : i32
    %c0_i32_1 = arith.constant 0 : i32
    %c0_i32_2 = arith.constant 0 : i32
    return %c0_i32, %c0_i32_0, %c0_i32_1 : i32, i32, i32
  }
  func.func @transform_4(%arg0: i32, %arg1: i32) -> (i32, i32) {
    %c0_i32 = arith.constant 0 : i32
    %c0_i32_0 = arith.constant 0 : i32
    %c0_i32_1 = arith.constant 0 : i32
    return %c0_i32, %c0_i32_0 : i32, i32
  }
  func.func @transform_5(%arg0: i32, %arg1: i32) -> (i32, i32) {
    %c0_i32 = arith.constant 0 : i32
    %c0_i32_0 = arith.constant 0 : i32
    %c0_i32_1 = arith.constant 0 : i32
    return %c0_i32, %c0_i32_0 : i32, i32
  }
  func.func @transform_6(%arg0: i32, %arg1: i32) -> (i32, i32) {
    %c0_i32 = arith.constant 0 : i32
    %c0_i32_0 = arith.constant 0 : i32
    %c0_i32_1 = arith.constant 0 : i32
    return %c0_i32, %c0_i32_0 : i32, i32
  }
  func.func @transform_7(%arg0: i32, %arg1: i32) -> (i32, i32, i32, i32) {
    %c0_i32 = arith.constant 0 : i32
    %c0_i32_0 = arith.constant 0 : i32
    %c0_i32_1 = arith.constant 0 : i32
    return %arg0, %arg1, %c0_i32, %c0_i32_0 : i32, i32, i32, i32
  }
}

</mosaic_0001>

<bundles_post_ra>
// kernel: tpu_custom_call.1
= control target key start
LH: loop header
LB: loop body
LE: loop exit
PB: predicated region body
PF: predicated region fallthrough
CT: control target
= control target key end

     0   :  { %s4739_s0 = inlined_call_operand.hbm [shape: bf16[2,16,16,128], index: 0, kind: input, shape index: {}]   ;;  %s4740_s1 = inlined_call_operand.hbm [shape: bf16[128,128], index: 1, kind: input, shape index: {}]   ;;  %s4741_s2 = inlined_call_operand.vmem [shape: f32[1,128], index: 2, kind: input, shape index: {}]   ;;  %s4742_s3 = inlined_call_operand.hbm [shape: f32[3,3,128], index: 3, kind: input, shape index: {}]   ;;  %s4743_s4 = inlined_call_operand.vmem [shape: f32[1,128], index: 4, kind: input, shape index: {}]   ;;  %s4744_s5 = inlined_call_operand.hbm [shape: bf16[128,128], index: 5, kind: input, shape index: {}]   ;;  %s4745_s6 = inlined_call_operand.vmem [shape: f32[1,128], index: 6, kind: input, shape index: {}]   ;;  %s4746_s7 = inlined_call_operand.hbm [shape: f32[2,16,16,128], index: 7, kind: output, shape index: {}]  }
   0x1   :  { %4789 = sst [smem:[#allocation79_spill]] %s4740_s1 }
   0x2   :  { %4790 = sst [smem:[#allocation80_spill]] %s4742_s3 }
   0x3   :  { %4791 = sst [smem:[#allocation81_spill]] %s4743_s4 }
   0x4   :  { %4792 = sst [smem:[#allocation82_spill]] %s4745_s6 }
   0x5   :  { %4793 = sst [smem:[#allocation83_spill]] %s4746_s7 }
   0x6   :  { %12 = vsyncpa [#allocation3], 0 }
   0x7   :  { %14 = vsyncpa [#allocation3 + $0x1], 0 }
   0x8   :  { %15 = vsyncpa [#allocation6], 0 }
   0x9   :  { %16 = vsyncpa [#allocation9], 0 }
   0xa   :  { %17 = vsyncpa [#allocation4], 0 }
   0xb   :  { %19 = vsyncpa [#allocation4 + $0x1], 0  ;;  %s3128_s24 = smov 0   ;;  %s3130_s25 = smov 0  }
   0xc   :  { %s3132_s26 = smov 0   ;;  %s3134_s27 = smov 0  }
   0xd   :  { %s3136_s28 = smov 0   ;;  %s3138_s29 = smov 0  }
   0xe   :  { %s3140_s30 = smov 0   ;;  %s3142_s8 = smov 0  }
   0xf   :  { %s3144_s9 = smov 0   ;;  %s3146_s10 = smov 0  }
  0x10   :  { %s3148_s11 = smov 0  }
  0x11 LB: > { %4794 = sst [smem:[#allocation15_spill]] %s3034_s24  ;;  %s2359_s12 = sadd.s32 4294967295, %s3074_s11   ;;  %s3074_s11 = sphi %s3148_s11, %s25_s11   ;;  %s3070_s10 = sphi %s3146_s10, %s5016_s10   ;;  %s3066_s9 = sphi %s3144_s9, %s5015_s9   ;;  %s3062_s8 = sphi %s3142_s8, %s5014_s8   ;;  %s3058_s30 = sphi %s3140_s30, %s5013_s30   ;;  %s3054_s29 = sphi %s3138_s29, %s5012_s29   ;;  %s3050_s28 = sphi %s3136_s28, %s5011_s28   ;;  %s3046_s27 = sphi %s3134_s27, %s5010_s27   ;;  %s3042_s26 = sphi %s3132_s26, %s5009_s26   ;;  %s3038_s25 = sphi %s3130_s25, %s5008_s25   ;;  %s3034_s24 = sphi %s3128_s24, %s5007_s24  }
  0x12   : > { %4795 = sst [smem:[#allocation16_spill]] %s3038_s25  ;;  %s2360_s13 = sadd.s32 4294967294, %s3074_s11  }
  0x13   : > { %4796 = sst [smem:[#allocation17_spill]] %s3062_s8  ;;  %p57_p0 = scmp.ne.s32.totalorder %s3050_s28, %s3046_s27 }
  0x14   : > { %p3184_p1 = scmp.eq.s32.totalorder %s2359_s12, 0  ;;  %p208_p2 = scmp.ne.s32.totalorder %s3042_s26, %s3038_s25 }
  0x15   : > { %p209_p4 = scmp.eq.s32.totalorder %s2359_s12, 3  ;;  %p214_p5 = scmp.ne.s32.totalorder %s3038_s25, %s3034_s24 }
  0x16   : > { %s4797_s14 = scalar_select %p3184_p1, 1, 0 }
  0x17   : > { %p3193_p3 = por %p3184_p1, %p57_p0  ;;  %p215_p6 = scmp.eq.s32.totalorder %s2360_s13, 3 }
  0x18   : > { %p3199_p7 = por %p209_p4, %p208_p2  ;;  %p2361_p8 = scmp.ge.s32.totalorder %s3074_s11, 1 }
  0x19   : > { %s4798_s16 = scalar_select %p3193_p3, 1, 0 }
  0x1a   : > { %s4799_s17 = scalar_select %p3199_p7, 1, 0 }
  0x1b   : > { %p3204_p9 = por %p215_p6, %p214_p5  ;;  %p222_p10 = scmp.lt.s32.totalorder %s3074_s11, 5 }
  0x1c   : > { %4800 = sst [smem:[#allocation18_spill]] %s4799_s17  ;;  %s3076_s20 = smov [#allocation5]  }
  0x1d   : > { %s4801_s18 = scalar_select %p3204_p9, 1, 0 }
  0x1e   : > { %p3209_p11 = pnand %p2361_p8, %p222_p10  ;;  %s234_s21 = sshll.u32 %s3076_s20, 4  ;;  %s3213_s21 = int_to_ptr.vmem [resolvable:$true] %s234_s21 }
  0x1f   : > { %4802 = sst [smem:[#allocation19_spill]] %s4801_s18  ;;  %s3077_s23 = smov [#allocation7]  }
  0x20   : > { %s4803_s19 = scalar_select %p3209_p11, 1, 0 }
  0x21   : > { %p2615_p12 = pneg %p3209_p11  ;;  %s250_s27 = sshll.u32 %s3077_s23, 4  ;;  %s3223_s27 = int_to_ptr.vmem [resolvable:$true] %s250_s27 }
  0x22   : > { %s3078_s12 = smov [#allocation8]   ;;  %s4805_s1 = sld [smem:[#allocation79_spill]] }
  0x23   : > { %p3219_p13 = pnand %p2615_p12, %p3184_p1  ;;  %s3225_s13 = sshll.u32 %s3078_s12, 4  ;;  %s267_s13 = int_to_ptr.vmem [resolvable:$true] %s3225_s13 }
  0x25   : > { %p3235_p2 = pneg %p3219_p13 }
  0x28   : > { %s2830_s20 = scalar_lea.hbm %s4805_s1, 1024 }
  0x29   : > { %p2831_p0 = scmp.ne.s32.totalorder %s4805_s1, %s2830_s20  ;;  %p2837_p6 = scmp.lt.u32.totalorder %s2830_s20, %s4805_s1 }
  0x2b   : > { %p2833_p4 = pnand %p3235_p2, %p2831_p0 }
  0x2d   : > { %p2834_p5 = pneg %p2833_p4 }
  0x2f   : > { %p2839_p8 = pnand %p2837_p6, %p2834_p5 }
  0x31   : > { %2842 = shalt.err (!%p2839_p8)
}
  0x32   : > { %s2843_s7 = scalar_lea.vmem %s3213_s21, 1024  ;;  %p2851_p7 = scmp.lt.s32.totalorder %s3213_s21, %s3213_s21 }
  0x33   : > { %p2844_p10 = scmp.ne.s32.totalorder %s3213_s21, %s2843_s7  ;;  %p2852_p1 = scmp.lt.s32.totalorder %s2843_s7, %s2843_s7 }
  0x35   : > { %p2846_p12 = pnand %p2844_p10, %p3235_p2  ;;  %p2853_p0 = por %p2852_p1, %p2851_p7 }
  0x37   : > { %p2847_p9 = pneg %p2846_p12 }
  0x39   : > { %p2854_p4 = pnand %p2853_p0, %p2847_p9 }
  0x3b   : > { %2857 = shalt.err (!%p2854_p4)
}
  0x3c   : > { %s4760_s24 = smov 64   ;;  %s4761_s15 = smov 4  }
  0x3d   : > { %2618 = dma.hbm_to_vmem [thread:$0]  (!%p3219_p13), %s4805_s1, 1024, %s3213_s21, [#allocation6], %s4760_s24, %s4760_s24, %s4761_s15  }
  0x3e   : > { %s4807_s3 = sld [smem:[#allocation80_spill]] }
  0x44   : > { %s2858_s7 = scalar_lea.hbm %s4807_s3, 192 }
  0x45   : > { %p2859_p1 = scmp.ne.s32.totalorder %s4807_s3, %s2858_s7  ;;  %p2865_p5 = scmp.lt.u32.totalorder %s2858_s7, %s4807_s3 }
  0x47   : > { %p2861_p7 = pnand %p2859_p1, %p3235_p2 }
  0x49   : > { %p2862_p9 = pneg %p2861_p7 }
  0x4b   : > { %p2867_p6 = pnand %p2865_p5, %p2862_p9 }
  0x4d   : > { %2870 = shalt.err (!%p2867_p6)
}
  0x4e   : > { %s2871_s21 = scalar_lea.vmem %s3223_s27, 192  ;;  %p2879_p0 = scmp.lt.s32.totalorder %s3223_s27, %s3223_s27 }
  0x4f   : > { %p2872_p8 = scmp.ne.s32.totalorder %s3223_s27, %s2871_s21  ;;  %p2880_p4 = scmp.lt.s32.totalorder %s2871_s21, %s2871_s21 }
  0x51   : > { %p2874_p10 = pnand %p2872_p8, %p3235_p2  ;;  %p2881_p1 = por %p2880_p4, %p2879_p0 }
  0x53   : > { %p2875_p12 = pneg %p2874_p10 }
  0x55   : > { %p2882_p7 = pnand %p2881_p1, %p2875_p12 }
  0x57   : > { %2885 = shalt.err (!%p2882_p7)
}
  0x58   : > { %2621 = dma.hbm_to_vmem [thread:$0]  (!%p3219_p13), %s4807_s3, 192, %s3223_s27, [#allocation6], %s4760_s24, %s4760_s24, %s4761_s15  }
  0x59   : > { %s2886_s18 = scalar_lea.hbm %s4744_s5, 1024 }
  0x5a   : > { %p2887_p9 = scmp.ne.s32.totalorder %s4744_s5, %s2886_s18  ;;  %p2893_p8 = scmp.lt.u32.totalorder %s2886_s18, %s4744_s5 }
  0x5c   : > { %p2889_p5 = pnand %p2887_p9, %p3235_p2 }
  0x5e   : > { %p2890_p6 = pneg %p2889_p5 }
  0x60   : > { %p2895_p10 = pnand %p2893_p8, %p2890_p6 }
  0x62   : > { %2898 = shalt.err (!%p2895_p10)
}
  0x63   : > { %s2899_s21 = scalar_lea.vmem %s267_s13, 1024  ;;  %p2907_p1 = scmp.lt.s32.totalorder %s267_s13, %s267_s13 }
  0x64   : > { %p2900_p12 = scmp.ne.s32.totalorder %s267_s13, %s2899_s21  ;;  %p2908_p7 = scmp.lt.s32.totalorder %s2899_s21, %s2899_s21 }
  0x66   : > { %p2902_p0 = pnand %p2900_p12, %p3235_p2  ;;  %p2909_p3 = por %p2908_p7, %p2907_p1 }
  0x68   : > { %p2903_p4 = pneg %p2902_p0 }
  0x6a   : > { %p2910_p11 = pnand %p2909_p3, %p2903_p4 }
  0x6c   : > { %2913 = shalt.err (!%p2910_p11)
}
  0x6d   : > { %2624 = dma.hbm_to_vmem [thread:$0]  (!%p3219_p13), %s4744_s5, 1024, %s267_s13, [#allocation9], %s4760_s24, %s4760_s24, %s4761_s15  }
  0x6e   : > { %s34_s17 = sadd.s32 1, %s3066_s9  ;;  %s37_s22 = sadd.s32 1, %s3070_s10 }
  0x6f   : > { %p35_p3 = scmp.ge.s32.totalorder %s34_s17, 2  ;;  %s44_s6 = sadd.s32 1, %s3054_s29 }
  0x70   : > { %p51_p11 = scmp.ne.s32.totalorder %s3054_s29, %s3050_s28  ;;  %p52_p2 = scmp.eq.s32.totalorder %s3074_s11, 0 }
  0x71   : > { %s5018_s17 = smov (%p35_p3, %s34_s17), 0  ;;  %s5020_s22 = smov (!%p35_p3, %s37_s22), %s3070_s10 }
  0x72   : > { %s194_s25 = ssub.s32 %s3066_s9, %s5018_s17  ;;  %p39_p9 = scmp.ge.s32.totalorder %s5020_s22, 2 }
  0x73   : > { %p2636_p5 = scmp.lt.s32.totalorder %s3074_s11, 4  ;;  %p3319_p13 = por %p52_p2, %p51_p11 }
  0x74   : > { %s283_s8 = sand.u32 1, %s3054_s29   ;;  %s5022_s22 = smov (%p39_p9, %s5020_s22), 0 }
  0x75   : > { %s2366_s18 = sshll.u32 %s283_s8, 7  ;;  %s41_s20 = ssub.s32 %s3070_s10, %s5022_s22 }
  0x76   : > { %p42_p6 = scmp.eq.s32.totalorder %s41_s20, 0  ;;  %s195_s23 = sor.u32 %s194_s25, %s41_s20 }
  0x77   : > { %p196_p8 = scmp.eq.s32.totalorder %s195_s23, 0  ;;  %s2439_s12 = sshll.u32 %s3070_s10, 11 }
  0x78   : > { %s3330_s7 = scalar_select %p42_p6, %s3054_s29, %s44_s6  }
  0x79   : > { %s4809_s21 = sadd.s32 1, %s3042_s26  ;;  %s3340_s15 = scalar_lea.hbm %s4739_s0, %s2439_s12 }
  0x7a   : > { %s3335_s27 = scalar_select %p196_p8, %s3042_s26, %s4809_s21  }
  0x7b   : > { %s287_s1 = scalar_lea.vmem [#allocation2], %s2366_s18  ;;  %p3348_p10 = pnand %p2636_p5, %p3319_p13 }
  0x7c   : > { %s294_s3 = sshll.u32 %s287_s1, 4  ;;  %s3352_s25 = scalar_lea.sflag [#allocation3], %s283_s8  ;;  %s3342_s3 = int_to_ptr.vmem [resolvable:$true] %s294_s3 }
  0x7d   : > { %s2914_s24 = scalar_lea.hbm %s3340_s15, 2048  ;;  %p2916_p0 = pneg %p3348_p10 }
  0x7e   : > { %p2915_p12 = scmp.ne.s32.totalorder %s3340_s15, %s2914_s24  ;;  %s2919_s13 = scalar_lea.hbm %s4739_s0, 4096 }
  0x7f   : > { %p2920_p7 = scmp.lt.u32.totalorder %s3340_s15, %s4739_s0  ;;  %p2921_p3 = scmp.lt.u32.totalorder %s2919_s13, %s2914_s24 }
  0x80   : > { %p2917_p4 = pnand %p2916_p0, %p2915_p12  ;;  %p2923_p2 = scmp.lt.u32.totalorder %s2914_s24, %s3340_s15 }
  0x81   : > { %p2922_p11 = por %p2921_p3, %p2920_p7 }
  0x82   : > { %p2918_p1 = pneg %p2917_p4 }
  0x83   : > { %p2924_p9 = por %p2923_p2, %p2922_p11 }
  0x85   : > { %p2925_p5 = pnand %p2924_p9, %p2918_p1 }
  0x87   : > { %2928 = shalt.err (!%p2925_p5)
}
  0x88   : > { %s2929_s8 = scalar_lea.vmem %s3342_s3, 2048  ;;  %s3081_s12 = smov [#allocation2]  }
  0x89   : > { %p2930_p13 = scmp.ne.s32.totalorder %s3342_s3, %s2929_s8  ;;  %s2934_s21 = sshll.u32 %s3081_s12, 4  ;;  %s2935_s21 = int_to_ptr.vmem [resolvable:$false] %s2934_s21 }
  0x8a   : > { %s2936_s4 = scalar_lea.vmem %s2935_s21, 4096  ;;  %p2937_p12 = scmp.lt.s32.totalorder %s3342_s3, %s2935_s21 }
  0x8b   : > { %p2932_p6 = pnand %p2930_p13, %p2916_p0  ;;  %p2938_p4 = scmp.lt.s32.totalorder %s2936_s4, %s2929_s8 }
  0x8d   : > { %p2933_p8 = pneg %p2932_p6  ;;  %p2939_p7 = por %p2938_p4, %p2937_p12 }
  0x8f   : > { %p2940_p3 = pnand %p2939_p7, %p2933_p8 }
  0x91   : > { %2943 = shalt.err (!%p2940_p3)
}
  0x92   : > { %s4811_s24 = smov 4   ;;  %s4812_s1 = smov 64  }
  0x93   : > { %2628 = dma.hbm_to_vmem [thread:$0]  (!%p3348_p10), %s3340_s15, 2048, %s3342_s3, %s3352_s25, %s4812_s1, %s4812_s1, %s4811_s24  }
  0x94   : > { %p4813_p0 = scmp.ne.s32.totalorder %s4803_s19, 0 }
  0x96   : > { %306 = sbr.rel (%p4813_p0) target bundleno = 885 (0x375), region = 48 }
  0x9d   : > { %s308_s18 = sand.u32 1, %s3050_s28   ;;  %p4814_p1 = scmp.ne.s32.totalorder %s4798_s16, 0 }
  0x9e   : > { %s2370_s13 = sshll.u32 %s308_s18, 7  ;;  %s309_s20 = scalar_lea.sflag [#allocation3], %s308_s18 }
  0x9f   : > { %s3386_s23 = scalar_lea.vmem [#allocation2], %s2370_s13 }
  0xa0   : > { %3017 = dma.done.wait (%p4814_p1), %s309_s20, 2048  }
  0xa1   : > { %3019 = vsyncadd (%p4814_p1), %s309_s20, 4294965248  ;;  %p4815_p11 = scmp.ne.s32.totalorder %s4797_s14, 0 }
  0xa3   : > { %3021 = dma.done.wait (%p4815_p11), [#allocation6], 1216  }
  0xa4   : > { %3023 = vsyncadd (%p4815_p11), [#allocation6], 4294966080 }
  0xa5   : > { %3025 = dma.done.wait (%p4815_p11), [#allocation9], 1024  }
  0xa6   : > { %3027 = vsyncadd (%p4815_p11), [#allocation9], 4294966272  ;;  %s2375_s3 = sshll.u32 %s3058_s30, 3  ;;  %v4762_v0 = vmov 0.0   ;;  %vm3083_vm0 = vmmov 0   ;;  %s2441_s15 = sshll.u32 %s3058_s30, 6  ;;  %v715_v27 = vlaneseq }
  0xa7   : > { %2527 = vmatprep.subr.bf16.mxu1 %v4762_v0  ;;  %2543 = vmatprep.mubr.msk.bf16.mxu1 %vm3083_vm0, %v4762_v0  ;;  %s2395_s16 = sadd.s32 4294967295, %s2375_s3  ;;  %s602_s19 = sadd.s32 8, %s2375_s3  ;;  %v2739_v1 = vld [vmem:[#allocation5] sm:$0xff]   ;;  %v2740_v2 = vld [vmem:[#allocation5 + $0x8] sm:$0xff]   ;;  %v2741_v3 = vld [vmem:[#allocation5 + $0x10] sm:$0xff]   ;;  %vm1116_vm5 = vcmask 1040384  }
  0xa8   : > { %p600_p10 = scmp.gt.s32.totalorder %s2395_s16, 0  ;;  %p603_p2 = scmp.lt.s32.totalorder %s602_s19, 15  ;;  %2495 = vmatprep.subr.bf16.mxu0 %v2739_v1  ;;  %2528 = vmatpush3.bf16.msra.mxu1 %v2739_v1  ;;  %v2742_v4 = vld [vmem:[#allocation5 + $0x18] sm:$0xff]   ;;  %v2743_v6 = vld [vmem:[#allocation5 + $0x20] sm:$0xff]   ;;  %v2744_v7 = vld [vmem:[#allocation5 + $0x28] sm:$0xff]   ;;  %v3439_v28 = vshrl.u32 %v715_v27, 7 }
  0xa9   : > { %2496 = vmatpush3.bf16.msra.mxu0 %v2739_v1  ;;  %2529 = vmatprep.subr.bf16.mxu1 %v4762_v0  ;;  %s3407_s14 = scalar_lea.vmem %s3386_s23, %s2441_s15 [#allocation2]  ;;  %v2745_v8 = vld [vmem:[#allocation5 + $0x30] sm:$0xff]   ;;  %v2746_v9 = vld [vmem:[#allocation5 + $0x38] sm:$0xff]   ;;  %v2760_v22 = vld [vmem:[#allocation8 + $0x18] sm:$0xff]   ;;  %p593_p9 = scmp.gt.s32.totalorder %s3058_s30, 0  ;;  %vm1197_vm10 = vcmask 1046528  }
  0xaa   : > { %s5024_s16 = smov (!%p600_p10, %s2395_s16), 0  ;;  %s5026_s19 = smov (!%p603_p2, %s602_s19), 15  ;;  %2497 = vmatprep.subr.bf16.mxu0 %v2740_v2  ;;  %v2747_v5 = vld [vmem:[%s3407_s14] sm:$0xff]   ;;  %v2749_v11 = vld [vmem:[%s3407_s14 + $0x8] sm:$0xff]   ;;  %v2750_v12 = vld [vmem:[%s3407_s14 + $0x10] sm:$0xff]   ;;  %4816 = vst [vmem:[#allocation20_spill] sm:$0xff] %v3439_v28 }
  0xab   : > { %s2442_s6 = sshll.u32 %s5024_s16, 3  ;;  %s2443_s25 = sshll.u32 %s5026_s19, 3  ;;  %2511 = vmatprep.mubr.bf16.mxu0 %v2747_v5  ;;  %v2751_v13 = vld [vmem:[%s3407_s14 + $0x18] sm:$0xff]   ;;  %v2752_v14 = vld [vmem:[%s3407_s14 + $0x20] sm:$0xff]   ;;  %v2753_v15 = vld [vmem:[%s3407_s14 + $0x28] sm:$0xff]   ;;  %v740_v29 = vand.u32 15, %v3439_v28 }
  0xac   : > { %2530 = vmatpush3.bf16.msra.mxu1 %v2740_v2  ;;  %s607_s8 = scalar_lea.vmem %s3386_s23, %s2442_s6 [#allocation2]  ;;  %s3413_s12 = scalar_lea.vmem %s3386_s23, %s2443_s25 [#allocation2]  ;;  %v2754_v16 = vld [vmem:[%s3407_s14 + $0x30] sm:$0xff]   ;;  %v2755_v17 = vld [vmem:[%s3407_s14 + $0x38] sm:$0xff]   ;;  %v2764_v26 = vld [vmem:[#allocation8 + $0x38] sm:$0xff]   ;;  %v1310_v30 = vsub.s32 1, %v3439_v28  ;;  %v1290_v33 = vsub.s32 0, %v3439_v28  ;;  %v717_v35 = vadd.s32 8, %v3439_v28 }
  0xad   : > { %2498 = vmatpush3.bf16.msra.mxu0 %v2740_v2  ;;  %2531 = vmatprep.subr.bf16.mxu1 %v4762_v0  ;;  %v2748_v10 = vld [vmem:[%s607_s8] sm:$0xff]   ;;  %v2757_v19 = vld [vmem:[#allocation8] sm:$0xff]   ;;  %v2758_v20 = vld [vmem:[#allocation8 + $0x8] sm:$0xff]   ;;  %s594_s21 = scalar_select %p593_p9, 1, 0  ;;  %vm976_vm1 = vcmp.ge.s32.totalorder %v740_v29, 1 }
  0xae   : > { %2499 = vmatprep.subr.bf16.mxu0 %v2741_v3  ;;  %v2756_v18 = vld [vmem:[%s3413_s12] sm:$0xff]   ;;  %v2761_v23 = vld [vmem:[#allocation8 + $0x20] sm:$0xff]   ;;  %v2762_v24 = vld [vmem:[#allocation8 + $0x28] sm:$0xff]   ;;  %v718_v36 = vadd.s32 16, %v3439_v28  ;;  %v720_v37 = vadd.s32 32, %v3439_v28  ;;  %v719_v38 = vadd.s32 24, %v3439_v28 }
  0xaf   : > { %v2759_v21 = vld [vmem:[#allocation8 + $0x10] sm:$0xff]   ;;  %s595_s4 = scvt.s32.f32 %s594_s21  ;;  %v1279_v32 = vld [vmem:[#allocation7 + $0x4] sm:$0x7]  ;;  %v3444_v34 = vld [vmem:[#allocation7 + $0x8] sm:$0x7]  ;;  %v722_v39 = vadd.s32 48, %v3439_v28 }
  0xb0   : > { %2532 = vmatpush3.bf16.msra.mxu1 %v2741_v3  ;;  %v2763_v25 = vld [vmem:[#allocation8 + $0x30] sm:$0xff]   ;;  %v724_v40 = vadd.s32 64, %v3439_v28  ;;  %v723_v43 = vadd.s32 56, %v3439_v28  ;;  %v3458_v44 = vsel %vm976_vm1, 1.0, %v4762_v0  ;;  %v3461_v45 = vsub.s32 2, %v3439_v28  ;;  %p596_p5 = scmp.lt.s32.totalorder %s3058_s30, 1 }
  0xb1   : > { %2500 = vmatpush3.bf16.msra.mxu0 %v2741_v3  ;;  %2533 = vmatprep.subr.bf16.mxu1 %v4762_v0  ;;  %v1278_v31 = vld [vmem:[#allocation7] sm:$0x7]  ;;  %v3452_v41 = vstv %s595_s4  ;;  %v3463_v46 = vrot.slane %v1279_v32, %v1310_v30  ;;  %v3466_v47 = vrot.slane %v3444_v34, %v1310_v30  ;;  %v747_v49 = vand.u32 15, %v717_v35  ;;  %s4865_s3 = sld [smem:[#allocation81_spill]]  ;;  %s4998_s15 = sld [smem:[#allocation16_spill]] }
  0xb2   : > { %2501 = vmatprep.subr.bf16.mxu0 %v2742_v4  ;;  %v3454_v42 = vrot.slane %v1278_v31, %v1310_v30  ;;  %v3468_v48 = vrot.slane %v1278_v31, %v1290_v33  ;;  %v754_v50 = vand.u32 15, %v718_v36  ;;  %v768_v51 = vand.u32 15, %v720_v37  ;;  %s3511_s24 = scalar_select %p596_p5, 1, 0 }
  0xb3   : > { %v761_v52 = vand.u32 15, %v719_v38  ;;  %v782_v53 = vand.u32 15, %v722_v39  ;;  %v796_v54 = vand.u32 15, %v724_v40  ;;  %v721_v55 = vadd.s32 40, %v3439_v28  ;;  %s4999_s12 = sld [smem:[#allocation82_spill]]  ;;  %s5000_s4 = sld [smem:[#allocation17_spill]] }
  0xb4   : > { %2534 = vmatpush3.bf16.msra.mxu1 %v2742_v4  ;;  %v789_v56 = vand.u32 15, %v723_v43  ;;  %v726_v57 = vadd.s32 80, %v3439_v28  ;;  %v728_v58 = vadd.s32 96, %v3439_v28  ;;  %v730_v59 = vadd.s32 112, %v3439_v28  ;;  %s598_s13 = scvt.s32.f32 %s3511_s24  ;;  %s2444_s24 = sshll.u32 %s3058_s30, 4 }
  0xb5   : > { %2502 = vmatpush3.bf16.msra.mxu0 %v2742_v4  ;;  %2535 = vmatprep.subr.bf16.mxu1 %v4762_v0  ;;  %v3476_v60 = vrot.slane %v1278_v31, %v3461_v45  ;;  %v3478_v61 = vrot.slane %v1279_v32, %v1290_v33  ;;  %v733_v62 = vadd.s32 136, %v3439_v28  ;;  %v734_v63 = vadd.s32 144, %v3439_v28  ;;  %s5001_s23 = sld [smem:[#allocation18_spill]] }
  0xb6   : > { %2503 = vmatprep.subr.bf16.mxu0 %v2743_v6  ;;  %vm978_vm2 = vcmp.ge.s32.totalorder %v754_v50, 1  ;;  %vm3485_vm3 = vcmp.le.s32.totalorder %v747_v49, 14  ;;  %vm3489_vm4 = vcmp.ge.s32.totalorder %v768_v51, 1  ;;  %vm3493_vm6 = vcmp.le.s32.totalorder %v761_v52, 14 }
  0xb7   : > { %4817 = vst [vmem:[#allocation21_spill] sm:$0xff] %v3476_v60  ;;  %4818 = vst [vmem:[#allocation22_spill] sm:$0xff] %v3478_v61  ;;  %vm3497_vm7 = vcmp.ge.s32.totalorder %v782_v53, 1  ;;  %vm3501_vm8 = vcmp.ge.s32.totalorder %v796_v54, 1  ;;  %vm3505_vm9 = vcmp.le.s32.totalorder %v789_v56, 14  ;;  %v3588_v51 = vrot.slane %v3444_v34, %v3461_v45  ;;  %s352_s14 = sand.u32 1, %s4998_s15  }
  0xb8   : > { %2536 = vmatpush3.bf16.msra.mxu1 %v2743_v6  ;;  %s2374_s6 = sshll.u32 %s352_s14, 7  ;;  %s4678_s25 = scalar_lea.sflag [#allocation4], %s352_s14 }
  0xb9   : > { %2504 = vmatpush3.bf16.msra.mxu0 %v2743_v6  ;;  %2537 = vmatprep.subr.bf16.mxu1 %v4762_v0  ;;  %4845 = vst [vmem:[#allocation25_spill] sm:$0xff] %v3588_v51  ;;  %s4648_s21 = scalar_lea.vmem [#allocation10], %s2374_s6  ;;  %s2435_s1 = sshll.u32 %s5000_s4, 5 }
  0xba   : > { %2505 = vmatprep.subr.bf16.mxu0 %v2744_v7  ;;  %s2234_s18 = sadd.s32 %s2444_s24, %s2435_s1  ;;  %s2237_s20 = sshll.u32 %s4648_s21, 4  ;;  %s4671_s20 = int_to_ptr.vmem [resolvable:$true] %s2237_s20 }
  0xbb   : > { %s5002_s6 = sld [smem:[#allocation83_spill]]  ;;  %s2944_s8 = scalar_lea.vmem %s4671_s20, 2048 }
  0xbc   : > { %2538 = vmatpush3.bf16.msra.mxu1 %v2744_v7  ;;  %p2945_p13 = scmp.ne.s32.totalorder %s4671_s20, %s2944_s8  ;;  %p5003_p6 = scmp.ne.s32.totalorder %s5001_s23, 0 }
  0xbd   : > { %2506 = vmatpush3.bf16.msra.mxu0 %v2744_v7  ;;  %2539 = vmatprep.subr.bf16.mxu1 %v4762_v0 }
  0xbe   : > { %2507 = vmatprep.subr.bf16.mxu0 %v2745_v8  ;;  %p2946_p8 = pnand %p2945_p13, %p5003_p6 }
  0xc0   : > { %2540 = vmatpush3.bf16.msra.mxu1 %v2745_v8  ;;  %p2947_p12 = pneg %p2946_p8 }
  0xc1   : > { %2508 = vmatpush3.bf16.msra.mxu0 %v2745_v8  ;;  %2541 = vmatprep.subr.bf16.mxu1 %v4762_v0 }
  0xc2   : > { %2509 = vmatprep.subr.bf16.mxu0 %v2746_v9 }
  0xc4   : > { %2542 = vmatpush3.bf16.msra.mxu1 %v2746_v9 }
  0xc5   : > { %2510 = vmatpush3.bf16.msra.mxu0 %v2746_v9  ;;  %2567 = vmatprep.subr.bf16.mxu1 %v2757_v19 }
  0xc6   : > { %2547 = vmatprep.subr.bf16.mxu0 %v4762_v0 }
  0xc7   : > { %2544 = vmatmul.mubr.bf16.vlgmr.msra.gmra.mrb[0].mxu1 %v2748_v10  ;;  %v824_v10 = vand.u32 15, %v728_v58 }
  0xc8   : > { %2512 = vmatmul.mubr.bf16.vlgmr.msra.gmra.mrb[0].mxu0 %v2749_v11  ;;  %2568 = vmatpush3.bf16.msra.mxu1 %v2757_v19  ;;  %v838_v11 = vand.u32 15, %v730_v59  ;;  %v3535_v19 = vsel %vm3493_vm6, 1.0, %v4762_v0 }
  0xc9   : > { %2548 = vmatpush3.bf16.msra.mxu0 %v2739_v1  ;;  %2515 = vmatprep.mubr.bf16.mxu0 %v2750_v12  ;;  %v3483_v1 = vrot.slane %v1279_v32, %v3461_v45  ;;  %v3516_v12 = vld [vmem:[%s4741_s2] ss:$0 sm:$0xff]  ;;  %vm3564_vm13 = vcmp.ge.s32.totalorder %v824_v10, 1 }
  0xca   : > { %2549 = vmatprep.subr.bf16.mxu0 %v4762_v0  ;;  %2569 = vmatprep.subr.bf16.mxu1 %v2758_v20  ;;  %vm3568_vm14 = vcmp.ge.s32.totalorder %v838_v11, 1  ;;  %v3606_v56 = vsel %vm3564_vm13, 1.0, %v4762_v0 }
  0xcb   : > { %4846 = vst [vmem:[#allocation26_spill] sm:$0xff] %v3606_v56 }
  0xcc   : > { %2570 = vmatpush3.bf16.msra.mxu1 %v2758_v20  ;;  %v3538_v20 = vrot.slane %v3444_v34, %v1290_v33  ;;  %v3611_v34 = vsel %vm3568_vm14, 1.0, %v4762_v0 }
  0xcd   : > { %2550 = vmatpush3.bf16.msra.mxu0 %v2740_v2  ;;  %2571 = vmatprep.subr.bf16.mxu1 %v2759_v21  ;;  %v3631_v2 = vadd.s32 72, %v3439_v28 }
  0xce   : > { %2551 = vmatprep.subr.bf16.mxu0 %v4762_v0 }
  0xd0   : > { %2516 = vmatmul.mubr.bf16.gmra.mrb[4].mxu0 %v2751_v13  ;;  %2572 = vmatpush3.bf16.msra.mxu1 %v2759_v21  ;;  %v3519_v13 = vsel %vm978_vm2, 1.0, %v4762_v0 }
  0xd1   : > { %2552 = vmatpush3.bf16.msra.mxu0 %v2741_v3  ;;  %2519 = vmatprep.mubr.bf16.mxu0 %v2752_v14  ;;  %v859_v14 = vand.u32 15, %v733_v62  ;;  %v3634_v3 = vadd.s32 88, %v3439_v28 }
  0xd2   : > { %2553 = vmatprep.subr.bf16.mxu0 %v4762_v0  ;;  %2573 = vmatprep.subr.bf16.mxu1 %v2760_v22 }
  0xd4   : > { %2574 = vmatpush3.bf16.msra.mxu1 %v2760_v22  ;;  %v3543_v22 = vsel %vm3497_vm7, 1.0, %v4762_v0 }
  0xd5   : > { %2554 = vmatpush3.bf16.msra.mxu0 %v2742_v4  ;;  %2575 = vmatprep.subr.bf16.mxu1 %v2761_v23  ;;  %v3637_v4 = vadd.s32 104, %v3439_v28 }
  0xd6   : > { %2555 = vmatprep.subr.bf16.mxu0 %v4762_v0 }
  0xd8   : > { %2520 = vmatmul.mubr.bf16.gmra.mrb[8].mxu0 %v2753_v15  ;;  %2576 = vmatpush3.bf16.msra.mxu1 %v2761_v23  ;;  %v866_v15 = vand.u32 15, %v734_v63  ;;  %v3548_v23 = vsel %vm3501_vm8, 1.0, %v4762_v0 }
  0xd9   : > { %2556 = vmatpush3.bf16.msra.mxu0 %v2743_v6  ;;  %2523 = vmatprep.mubr.bf16.mxu0 %v2754_v16  ;;  %v735_v16 = vadd.s32 152, %v3439_v28  ;;  %4831 = vst [vmem:[#allocation23_spill] sm:$0xff] %v3548_v23 }
  0xda   : > { %2557 = vmatprep.subr.bf16.mxu0 %v4762_v0  ;;  %2577 = vmatprep.subr.bf16.mxu1 %v2762_v24  ;;  %vm3576_vm15 = vcmp.ge.s32.totalorder %v866_v15, 1 }
  0xdb   : > { %v873_v39 = vand.u32 15, %v735_v16  ;;  %v3618_v58 = vsel %vm3576_vm15, 1.0, %v4762_v0 }
  0xdc   : > { %2578 = vmatpush3.bf16.msra.mxu1 %v2762_v24  ;;  %v3553_v24 = vsel %vm3505_vm9, 1.0, %v4762_v0 }
  0xdd   : > { %2558 = vmatpush3.bf16.msra.mxu0 %v2744_v7  ;;  %2579 = vmatprep.subr.bf16.mxu1 %v2763_v25  ;;  %v775_v7 = vand.u32 15, %v721_v55  ;;  %4832 = vst [vmem:[#allocation24_spill] sm:$0xff] %v3553_v24  ;;  %vm3626_vm1 = vcmp.le.s32.totalorder %v873_v39, 14 }
  0xde   : > { %2559 = vmatprep.subr.bf16.mxu0 %v4762_v0 }
  0xdf   : > { %vm3555_vm11 = vcmp.le.s32.totalorder %v775_v7, 14 }
  0xe0   : > { %2524 = vmatmul.mubr.bf16.gmra.mrb[12].mxu0 %v2755_v17  ;;  %2580 = vmatpush3.bf16.msra.mxu1 %v2763_v25  ;;  %v3525_v17 = vsel %vm3485_vm3, 1.0, %v4762_v0  ;;  %v3593_v52 = vsel %vm3555_vm11, 1.0, %v4762_v0 }
  0xe1   : > { %2560 = vmatpush3.bf16.msra.mxu0 %v2745_v8  ;;  %2563 = vmatprep.mubr.msk.bf16.mxu0 %vm3083_vm0, %v4762_v0  ;;  %vm3580_vm0 = vcmp.le.s32.totalorder %v859_v14, 14 }
  0xe2   : > { %2561 = vmatprep.subr.bf16.mxu0 %v4762_v0  ;;  %2581 = vmatprep.subr.bf16.mxu1 %v2764_v26  ;;  %v3623_v59 = vsel %vm3580_vm0, 1.0, %v4762_v0 }
  0xe3   : > { %4847 = vst [vmem:[#allocation27_spill] sm:$0xff] %v3623_v59 }
  0xe4   : > { %2582 = vmatpush3.bf16.msra.mxu1 %v2764_v26 }
  0xe5   : > { %2562 = vmatpush3.bf16.msra.mxu0 %v2746_v9  ;;  %v810_v9 = vand.u32 15, %v726_v57  ;;  %v3613_v57 = vstv %s598_s13  ;;  %s2436_s13 = sshll.u32 %s2234_s18, 7 }
  0xe6   : > { %s4669_s30 = scalar_lea.hbm %s5002_s6, %s2436_s13 }
  0xe7   : > { %vm3560_vm12 = vcmp.ge.s32.totalorder %v810_v9, 1 }
  0xe8   : > { %2564 = vmatmul.mubr.bf16.vlgmr.msra.gmra.mrb[16].mxu0 %v2756_v18  ;;  %v3530_v18 = vsel %vm3489_vm4, 1.0, %v4762_v0  ;;  %v3601_v55 = vsel %vm3560_vm12, 1.0, %v4762_v0 }
 0x19a   : > { %v655_v21 = vpop.f32.mrb[0].mxu1 }
 0x19b   : > { %v656_v26 = vadd.f32 %v3516_v12, %v655_v21  ;;  %v2513_v27 = vpop.f32.mrb[0].mxu0  ;;  %v2545_v29 = vpop.f32.mrb[1].mxu1 }
 0x19c   : > { %v3574_v33 = vadd.f32 %v2513_v27, %v3516_v12  ;;  %v530_v35 = vpop.f32.mrb[1].mxu0  ;;  %v658_v36 = vpop.f32.mrb[2].mxu1 }
 0x19d   : > { %v663_v40 = vmul.f32 %v3452_v41, %v656_v26  ;;  %v659_v43 = vadd.f32 %v3516_v12, %v658_v36  ;;  %v2514_v49 = vpop.f32.mrb[2].mxu0  ;;  %v2546_v50 = vpop.f32.mrb[3].mxu1  ;;  %v3596_v53 = vadd.f32 %v3516_v12, %v530_v35 }
 0x19e   : > { %v533_v54 = vpop.f32.mrb[3].mxu0  ;;  %v1124_v62 = vrot.slane %v3574_v33, 7  ;;  %v3642_v8 = vadd.f32 %v2514_v49, %v3516_v12  ;;  %v4764_v10 = vrot.slane %v3574_v33, 1 }
 0x19f   : > { %v1117_v45 = vrot.slane %v663_v40, 7  ;;  %v1198_v6 = vrot.slane %v663_v40, 1  ;;  %v664_v7 = vmul.f32 %v3452_v41, %v659_v43  ;;  %v1120_v11 = vrot.slane %v3596_v53, 7 }
 0x1a0   : > { %v1201_v14 = vrot.slane %v3596_v53, 1  ;;  %v1126_v21 = vrot.slane %v3642_v8, 7  ;;  %v534_v25 = vadd.f32 %v3516_v12, %v533_v54  ;;  %v1312_v27 = vmul.f32 %v3454_v42, %v663_v40 }
 0x1a1   : > { %v1176_v5 = vsel %vm1116_vm5, 0.0, %v1117_v45  ;;  %v1118_v15 = vrot.slane %v664_v7, 7  ;;  %v1199_v16 = vrot.slane %v664_v7, 1  ;;  %v1313_v29 = vmul.f32 %v3454_v42, %v664_v7 }
 0x1a2   : > { %v1177_v9 = vmul.f32 %v3458_v44, %v1176_v5  ;;  %v1314_v44 = vmul.f32 %v3454_v42, %v3596_v53  ;;  %v3668_v54 = vsel %vm1116_vm5, %v1124_v62, %v1126_v21  ;;  %v1122_v5 = vrot.slane %v534_v25, 7 }
 0x1a3   : > { %v2517_v26 = vpop.f32.mrb[4].mxu0  ;;  %v1119_v31 = vsel %vm1116_vm5, %v1117_v45, %v1118_v15  ;;  %v1121_v32 = vsel %vm1116_vm5, %v1118_v15, %v1120_v11  ;;  %v1200_v35 = vsel %vm1197_vm10, %v1198_v6, %v1199_v16  ;;  %v1202_v36 = vsel %vm1197_vm10, %v1199_v16, %v1201_v14 }
 0x1a4   : > { %v1292_v41 = vmul.f32 %v3468_v48, %v1177_v9  ;;  %v546_v30 = vpop.f32.mrb[5].mxu0  ;;  %v3660_v39 = vmul.f32 %v3519_v13, %v1121_v32  ;;  %v1259_v40 = vmul.f32 %v3525_v17, %v1202_v36  ;;  %v1293_v43 = vmul.f32 %v3468_v48, %v1119_v31 }
 0x1a5   : > { %v2518_v37 = vpop.f32.mrb[6].mxu0  ;;  %v1348_v50 = vmul.f32 %v3476_v60, %v1200_v35  ;;  %v1317_v45 = vmul.f32 %v3454_v42, %v3642_v8  ;;  %v1423_v7 = vmul.f32 %v3463_v46, %v3642_v8  ;;  %v1297_v15 = vmul.f32 %v3468_v48, %v3668_v54 }
 0x1a6   : > { %v1328_v38 = vadd.f32 %v1312_v27, %v1292_v41  ;;  %v549_v49 = vpop.f32.mrb[7].mxu0  ;;  %v1294_v13 = vmul.f32 %v3468_v48, %v3660_v39  ;;  %v1329_v6 = vadd.f32 %v1313_v29, %v1293_v43  ;;  %v1349_v17 = vmul.f32 %v3476_v60, %v1259_v40 }
 0x1a7   : > { %v1403_v16 = vmul.f32 %v3478_v61, %v3668_v54  ;;  %v1123_v41 = vsel %vm1116_vm5, %v1120_v11, %v1122_v5  ;;  %v3687_v29 = vsel %vm1116_vm5, %v1122_v5, %v1124_v62  ;;  %v1203_v32 = vrot.slane %v534_v25, 1 }
 0x1a8   : > { %v3677_v9 = vadd.f32 %v1348_v50, %v1328_v38  ;;  %v1330_v27 = vadd.f32 %v1314_v44, %v1294_v13  ;;  %v3684_v31 = vadd.f32 %v1349_v17, %v1329_v6  ;;  %v3689_v35 = vadd.f32 %v1317_v45, %v1297_v15 }
 0x1a9   : > { %v3691_v36 = vadd.f32 %v1423_v7, %v1403_v16  ;;  %v1295_v38 = vmul.f32 %v3468_v48, %v1123_v41  ;;  %v3699_v43 = vsel %vm3626_vm1, 1.0, %v4762_v0  ;;  %v3702_v11 = vsel %vm1197_vm10, %v1201_v14, %v1203_v32 }
 0x1aa   : > { %4850 = vst [vmem:[#allocation28_spill] sm:$0xff] %v3689_v35  ;;  %4852 = vst [vmem:[#allocation30_spill] sm:$0xff] %v3699_v43  ;;  %v1206_v62 = vsel %vm1197_vm10, %v1203_v32, %v4764_v10  ;;  %v1315_v44 = vmul.f32 %v3454_v42, %v534_v25  ;;  %v1350_v63 = vmul.f32 %v3476_v60, %v3702_v11  ;;  %v4859_v59 = vrot.slane %v3642_v8, 1 }
 0x1ab   : > { %4851 = vst [vmem:[#allocation29_spill] sm:$0xff] %v3691_v36  ;;  %v3694_v40 = vpop.f32.mrb[8].mxu0  ;;  %v1261_v5 = vmul.f32 %v3535_v19, %v1206_v62  ;;  %v1401_v13 = vmul.f32 %v3478_v61, %v1123_v41  ;;  %v3720_v17 = vmul.f32 %v3454_v42, %v3574_v33  ;;  %v1421_v15 = vmul.f32 %v3463_v46, %v534_v25 }
 0x1ac   : > { %v3708_v50 = vpop.f32.mrb[9].mxu0  ;;  %v1331_v7 = vadd.f32 %v1315_v44, %v1295_v38  ;;  %v3727_v62 = vadd.f32 %v1350_v63, %v1330_v27  ;;  %v3731_v0 = vadd.f32 %v2517_v26, %v3516_v12  ;;  %v3735_v14 = vmul.f32 %v3463_v46, %v3574_v33 }
 0x1ad   : > { %v3715_v6 = vpop.f32.mrb[10].mxu0  ;;  %4853 = vst [vmem:[#allocation31_spill] sm:$0xff] %v3720_v17  ;;  %v1351_v32 = vmul.f32 %v3476_v60, %v1261_v5  ;;  %v1457_v41 = vmul.f32 %v3483_v1, %v1261_v5  ;;  %v1437_v38 = vadd.f32 %v1421_v15, %v1401_v13  ;;  %v547_v25 = vadd.f32 %v3516_v12, %v546_v30 }
 0x1ae   : > { %v3723_v16 = vpop.f32.mrb[11].mxu0  ;;  %4854 = vst [vmem:[#allocation32_spill] sm:$0xff] %v3727_v62  ;;  %4855 = vst [vmem:[#allocation33_spill] sm:$0xff] %v3735_v14  ;;  %v3739_v44 = vadd.f32 %v2518_v37, %v3516_v12  ;;  %v3743_v19 = vmul.f32 %v3466_v47, %v3574_v33  ;;  %v3747_v27 = vmul.f32 %v3463_v46, %v3596_v53  ;;  %v1132_v53 = vrot.slane %v3731_v0, 7 }
 0x1af   : > { %v3749_v26 = vadd.f32 %v1351_v32, %v1331_v7  ;;  %v3753_v5 = vmul.f32 %v3454_v42, %v3731_v0  ;;  %v3756_v30 = vadd.f32 %v1457_v41, %v1437_v38  ;;  %v1128_v37 = vrot.slane %v547_v25, 7 }
 0x1b0   : > { %4856 = vst [vmem:[#allocation34_spill] sm:$0xff] %v3743_v19  ;;  %v550_v13 = vadd.f32 %v3516_v12, %v549_v49  ;;  %v3761_v15 = vmul.f32 %v3466_v47, %v3642_v8  ;;  %v1209_v32 = vrot.slane %v547_v25, 1  ;;  %v1318_v41 = vmul.f32 %v3454_v42, %v547_v25 }
 0x1b1   : > { %4857 = vst [vmem:[#allocation35_spill] sm:$0xff] %v3753_v5  ;;  %v1129_v10 = vsel %vm1116_vm5, %v1126_v21, %v1128_v37  ;;  %v1424_v38 = vmul.f32 %v3463_v46, %v547_v25  ;;  %v1134_v49 = vrot.slane %v3739_v44, 7  ;;  %v1530_v35 = vmul.f32 %v3466_v47, %v547_v25 }
 0x1b2   : > { %4858 = vst [vmem:[#allocation36_spill] sm:$0xff] %v3761_v15  ;;  %v1183_v5 = vmul.f32 %v3543_v22, %v1129_v10  ;;  %v3779_v7 = vsel %vm1197_vm10, %v4859_v59, %v1209_v32  ;;  %v1321_v21 = vmul.f32 %v3454_v42, %v3739_v44  ;;  %v1427_v28 = vmul.f32 %v3463_v46, %v3739_v44 }
 0x1b3   : > { %v3765_v45 = vpop.f32.mrb[12].mxu0  ;;  %v3787_v23 = vsel %vm1116_vm5, %v1132_v53, %v1134_v49  ;;  %v1130_v60 = vrot.slane %v550_v13, 7  ;;  %v1211_v22 = vrot.slane %v550_v13, 1 }
 0x1b4   : > { %v3773_v63 = vpop.f32.mrb[13].mxu0  ;;  %4860 = vst [vmem:[#allocation37_spill] sm:$0xff] %v3787_v23  ;;  %v1298_v59 = vmul.f32 %v3468_v48, %v1183_v5  ;;  %v1404_v17 = vmul.f32 %v3478_v61, %v1183_v5  ;;  %v1510_v25 = vmul.f32 %v3538_v20, %v1183_v5  ;;  %v1301_v36 = vmul.f32 %v3468_v48, %v3787_v23 }
 0x1b5   : > { %v3784_v56 = vpop.f32.mrb[14].mxu0  ;;  %v1407_v14 = vmul.f32 %v3478_v61, %v3787_v23  ;;  %v1131_v62 = vsel %vm1116_vm5, %v1128_v37, %v1130_v60  ;;  %v3802_v51 = vsel %vm1116_vm5, %v1130_v60, %v1132_v53  ;;  %v3805_v15 = vsel %vm1197_vm10, %v1209_v32, %v1211_v22  ;;  %v3818_v23 = vld [vmem:[%s4865_s3] ss:$0 sm:$0xff] }
 0x1b6   : > { %v3791_v10 = vpop.f32.mrb[15].mxu0  ;;  %4861 = vst [vmem:[#allocation38_spill] sm:$0xff] %v3802_v51  ;;  %v3807_v43 = vadd.f32 %v1318_v41, %v1298_v59  ;;  %v3809_v24 = vadd.f32 %v1424_v38, %v1404_v17  ;;  %v3811_v19 = vadd.f32 %v1530_v35, %v1510_v25  ;;  %v3813_v5 = vadd.f32 %v1321_v21, %v1301_v36 }
 0x1b7   : > { %v3822_v60 = vmul.f32 %v3478_v61, %v3660_v39  ;;  %v3824_v37 = vadd.f32 %v1427_v28, %v1407_v14  ;;  %v4867_v53 = vrot.slane %v3731_v0, 1  ;;  %v1299_v35 = vmul.f32 %v3468_v48, %v1131_v62 }
 0x1b8   : > { %4862 = vst [vmem:[#allocation39_spill] sm:$0xff] %v3807_v43  ;;  %4863 = vst [vmem:[#allocation40_spill] sm:$0xff] %v3809_v24  ;;  %v3834_v36 = vmul.f32 %v3530_v18, %v3687_v29  ;;  %v1319_v32 = vmul.f32 %v3454_v42, %v550_v13  ;;  %v1405_v41 = vmul.f32 %v3478_v61, %v1131_v62 }
 0x1b9   : > { %4864 = vst [vmem:[#allocation41_spill] sm:$0xff] %v3813_v5  ;;  %4866 = vst [vmem:[#allocation42_spill] sm:$0xff] %v3824_v37  ;;  %v3829_v17 = vsel %vm1197_vm10, %v1211_v22, %v4867_v53  ;;  %v1425_v39 = vmul.f32 %v3463_v46, %v550_v13  ;;  %v1511_v28 = vmul.f32 %v3538_v20, %v1131_v62 }
 0x1ba   : > { %v1531_v14 = vmul.f32 %v3466_v47, %v550_v13  ;;  %v3843_v21 = vadd.f32 %v3694_v40, %v3516_v12  ;;  %v3847_v22 = vadd.f32 %v3516_v12, %v3708_v50  ;;  %v3851_v29 = vadd.f32 %v3818_v23, %v3684_v31 }
 0x1bb   : > { %v705_v38 = vpop.f32.mrb[16].mxu0  ;;  %v3853_v59 = vadd.f32 %v1319_v32, %v1299_v35  ;;  %v3855_v25 = vadd.f32 %v1425_v39, %v1405_v41  ;;  %v3859_v62 = vadd.f32 %v3715_v6, %v3516_v12  ;;  %v3872_v31 = vadd.f32 %v3516_v12, %v3723_v16 }
 0x1bc   : > { %4868 = vst [vmem:[#allocation43_spill] sm:$0xff] %v3843_v21  ;;  %4869 = vst [vmem:[#allocation44_spill] sm:$0xff] %v3847_v22  ;;  %v2565_v18 = vpop.f32.mrb[17].mxu0  ;;  %v3864_v53 = vadd.f32 %v1531_v14, %v1511_v28  ;;  %v3868_v50 = vmul.f32 %v3454_v42, %v3843_v21  ;;  %v3876_v32 = vmul.f32 %v3463_v46, %v3843_v21  ;;  %v1136_v41 = vrot.slane %v3847_v22, 7 }
 0x1bd   : > { %4870 = vst [vmem:[#allocation45_spill] sm:$0xff] %v3853_v59  ;;  %4871 = vst [vmem:[#allocation46_spill] sm:$0xff] %v3855_v25  ;;  %v3861_v13 = vpop.f32.mrb[18].mxu0  ;;  %v3880_v6 = vmul.f32 %v3466_v47, %v3843_v21  ;;  %v4771_v39 = vrot.slane %v3847_v22, 1  ;;  %v1140_v28 = vrot.slane %v3843_v21, 7  ;;  %v1322_v14 = vmul.f32 %v3454_v42, %v3847_v22 }
 0x1be   : > { %4872 = vst [vmem:[#allocation47_spill] sm:$0xff] %v3859_v62  ;;  %4873 = vst [vmem:[#allocation48_spill] sm:$0xff] %v3864_v53  ;;  %v2566_v35 = vpop.f32.mrb[19].mxu0  ;;  %v1428_v16 = vmul.f32 %v3463_v46, %v3847_v22  ;;  %v1142_v18 = vrot.slane %v3859_v62, 7  ;;  %v1137_v40 = vsel %vm1116_vm5, %v1134_v49, %v1136_v41  ;;  %v3911_v49 = vmul.f32 %v3466_v47, %v3859_v62 }
 0x1bf   : > { %4874 = vst [vmem:[#allocation49_spill] sm:$0xff] %v3868_v50  ;;  %4875 = vst [vmem:[#allocation50_spill] sm:$0xff] %v3876_v32  ;;  %v4877_v50 = vrot.slane %v3739_v44, 1  ;;  %v3902_v5 = vmul.f32 %v3601_v55, %v1137_v40  ;;  %v1431_v35 = vmul.f32 %v3463_v46, %v3859_v62  ;;  %v1138_v59 = vrot.slane %v3872_v31, 7 }
 0x1c0   : > { %4876 = vst [vmem:[#allocation51_spill] sm:$0xff] %v3880_v6  ;;  %v1325_v6 = vmul.f32 %v3454_v42, %v3859_v62  ;;  %v3905_v37 = vsel %vm1116_vm5, %v1140_v28, %v1142_v18  ;;  %4881 = vst [vmem:[#allocation55_spill] sm:$0xff] %v3911_v49  ;;  %v1323_v25 = vmul.f32 %v3454_v42, %v3872_v31  ;;  %v4886_v53 = vrot.slane %v3843_v21, 1 }
 0x1c1   : > { %v3897_v32 = vsel %vm1197_vm10, %v4877_v50, %v4771_v39  ;;  %4879 = vst [vmem:[#allocation53_spill] sm:$0xff] %v3902_v5  ;;  %4880 = vst [vmem:[#allocation54_spill] sm:$0xff] %v3905_v37  ;;  %v1305_v50 = vmul.f32 %v3468_v48, %v3905_v37  ;;  %v1411_v39 = vmul.f32 %v3478_v61, %v3905_v37 }
 0x1c2   : > { %4878 = vst [vmem:[#allocation52_spill] sm:$0xff] %v3897_v32  ;;  %v1302_v40 = vmul.f32 %v3468_v48, %v3902_v5  ;;  %v1408_v43 = vmul.f32 %v3478_v61, %v3902_v5  ;;  %v1429_v49 = vmul.f32 %v3463_v46, %v3872_v31  ;;  %v3932_v37 = vsel %vm1116_vm5, %v1136_v41, %v1138_v59 }
 0x1c3   : > { %v3927_v24 = vadd.f32 %v1325_v6, %v1305_v50  ;;  %v3929_v32 = vadd.f32 %v1431_v35, %v1411_v39  ;;  %v3935_v55 = vsel %vm1116_vm5, %v1138_v59, %v1140_v28  ;;  %v3939_v22 = vmul.f32 %v3468_v48, %v3834_v36 }
 0x1c4   : > { %v3941_v5 = vadd.f32 %v1322_v14, %v1302_v40  ;;  %v3943_v51 = vadd.f32 %v1428_v16, %v1408_v43  ;;  %v4887_v6 = vrot.slane %v3872_v31, 1  ;;  %v1303_v59 = vmul.f32 %v3468_v48, %v3932_v37 }
 0x1c5   : > { %4882 = vst [vmem:[#allocation56_spill] sm:$0xff] %v3927_v24  ;;  %4883 = vst [vmem:[#allocation57_spill] sm:$0xff] %v3929_v32  ;;  %v1409_v28 = vmul.f32 %v3478_v61, %v3932_v37  ;;  %v587_v14 = vadd.f32 %v3765_v45, %v3516_v12  ;;  %v3961_v43 = vadd.f32 %v3516_v12, %v3773_v63 }
 0x1c6   : > { %4884 = vst [vmem:[#allocation58_spill] sm:$0xff] %v3941_v5  ;;  %4885 = vst [vmem:[#allocation59_spill] sm:$0xff] %v3943_v51  ;;  %v3950_v39 = vsel %vm1197_vm10, %v4887_v6, %v4886_v53  ;;  %v590_v16 = vadd.f32 %v3784_v56, %v3516_v12  ;;  %v3967_v53 = vadd.f32 %v3516_v12, %v3791_v10 }
 0x1c7   : > { %4888 = vst [vmem:[#allocation60_spill] sm:$0xff] %v3961_v43  ;;  %v706_v35 = vadd.f32 %v3516_v12, %v705_v38  ;;  %v3970_v50 = vadd.f32 %v1323_v25, %v1303_v59  ;;  %v3972_v40 = vadd.f32 %v1429_v49, %v1409_v28  ;;  %v1148_v6 = vrot.slane %v587_v14, 7 }
 0x1c8   : > { %v1229_v41 = vrot.slane %v587_v14, 1  ;;  %v3975_v45 = vmul.f32 %v3463_v46, %v587_v14  ;;  %v3978_v63 = vmul.f32 %v3466_v47, %v587_v14  ;;  %v1144_v56 = vrot.slane %v3961_v43, 7 }
 0x1c9   : > { %4889 = vst [vmem:[#allocation61_spill] sm:$0xff] %v3970_v50  ;;  %4890 = vst [vmem:[#allocation62_spill] sm:$0xff] %v3972_v40  ;;  %v4777_v24 = vrot.slane %v3961_v43, 1  ;;  %v1326_v10 = vmul.f32 %v3454_v42, %v3961_v43  ;;  %v1432_v38 = vmul.f32 %v3463_v46, %v3961_v43  ;;  %v3988_v25 = vmul.f32 %v3466_v47, %v3961_v43 }
 0x1ca   : > { %4891 = vst [vmem:[#allocation63_spill] sm:$0xff] %v3975_v45  ;;  %4892 = vst [vmem:[#allocation64_spill] sm:$0xff] %v3978_v63  ;;  %v1150_v49 = vrot.slane %v590_v16, 7  ;;  %v1145_v59 = vsel %vm1116_vm5, %v1142_v18, %v1144_v56  ;;  %v4894_v28 = vrot.slane %v3859_v62, 1  ;;  %v1231_v45 = vrot.slane %v590_v16, 1 }
 0x1cb   : > { %4893 = vst [vmem:[#allocation65_spill] sm:$0xff] %v3988_v25  ;;  %v1435_v63 = vmul.f32 %v3463_v46, %v590_v16  ;;  %v4000_v32 = vmul.f32 %v3611_v34, %v1145_v59  ;;  %v1541_v25 = vmul.f32 %v3466_v47, %v590_v16  ;;  %v1146_v5 = vrot.slane %v3967_v53, 7 }
 0x1cc   : > { %v3996_v14 = vsel %vm1197_vm10, %v4894_v28, %v4777_v24  ;;  %v1151_v50 = vsel %vm1116_vm5, %v1148_v6, %v1150_v49  ;;  %v4006_v18 = vsel %vm1197_vm10, %v1229_v41, %v1231_v45  ;;  %v4781_v24 = vrot.slane %v3967_v53, 1 }
 0x1cd   : > { %4895 = vst [vmem:[#allocation66_spill] sm:$0xff] %v3996_v14  ;;  %4896 = vst [vmem:[#allocation67_spill] sm:$0xff] %v4000_v32  ;;  %v1415_v43 = vmul.f32 %v3478_v61, %v1151_v50  ;;  %v1521_v28 = vmul.f32 %v3538_v20, %v1151_v50  ;;  %v1402_v40 = vmul.f32 %v3478_v61, %v3834_v36 }
 0x1ce   : > { %4897 = vst [vmem:[#allocation68_spill] sm:$0xff] %v4006_v18  ;;  %v1306_v34 = vmul.f32 %v3468_v48, %v4000_v32  ;;  %v1412_v16 = vmul.f32 %v3478_v61, %v4000_v32  ;;  %v4018_v59 = vsel %vm1116_vm5, %v1144_v56, %v1146_v5  ;;  %v4025_v50 = vsel %vm1116_vm5, %v1146_v5, %v1148_v6 }
 0x1cf   : > { %4898 = vst [vmem:[#allocation69_spill] sm:$0xff] %v4018_v59  ;;  %v4020_v51 = vadd.f32 %v1435_v63, %v1415_v43  ;;  %v4022_v18 = vadd.f32 %v1541_v25, %v1521_v28  ;;  %4901 = vst [vmem:[#allocation72_spill] sm:$0xff] %v4025_v50  ;;  %v4030_v14 = vsel %vm1197_vm10, %v4781_v24, %v1229_v41  ;;  %v4907_v25 = vrot.slane %v3642_v8, 1 }
 0x1d0   : > { %4902 = vst [vmem:[#allocation73_spill] sm:$0xff] %v4030_v14  ;;  %v4032_v21 = vadd.f32 %v1326_v10, %v1306_v34  ;;  %v4034_v62 = vadd.f32 %v1432_v38, %v1412_v16  ;;  %v1307_v56 = vmul.f32 %v3468_v48, %v4018_v59  ;;  %v1327_v43 = vmul.f32 %v3454_v42, %v3967_v53 }
 0x1d1   : > { %4899 = vst [vmem:[#allocation70_spill] sm:$0xff] %v4020_v51  ;;  %4900 = vst [vmem:[#allocation71_spill] sm:$0xff] %v4022_v18  ;;  %v1413_v63 = vmul.f32 %v3478_v61, %v4018_v59  ;;  %v1433_v5 = vmul.f32 %v3463_v46, %v3967_v53  ;;  %v4046_v41 = vmul.f32 %v3466_v47, %v3967_v53  ;;  %v4908_v28 = vrot.slane %v3574_v33, 1 }
 0x1d2   : > { %4903 = vst [vmem:[#allocation74_spill] sm:$0xff] %v4032_v21  ;;  %4904 = vst [vmem:[#allocation75_spill] sm:$0xff] %v4034_v62  ;;  %v713_v6 = vmul.f32 %v3613_v57, %v706_v35  ;;  %v1456_v10 = vmul.f32 %v3483_v1, %v3702_v11  ;;  %v4051_v38 = vadd.f32 %v1327_v43, %v1307_v56 }
 0x1d3   : > { %4905 = vst [vmem:[#allocation76_spill] sm:$0xff] %v4046_v41  ;;  %v709_v42 = vadd.f32 %v3516_v12, %v3861_v13  ;;  %v4060_v34 = vsel %vm1197_vm10, %v4908_v28, %v4907_v25  ;;  %v4062_v16 = vadd.f32 %v1433_v5, %v1413_v63  ;;  %v1383_v11 = vadd.f32 %v3818_v23, %v3749_v26 }
 0x1d4   : > { %4906 = vst [vmem:[#allocation77_spill] sm:$0xff] %v4051_v38  ;;  %v1152_v24 = vrot.slane %v713_v6, 7  ;;  %v1233_v51 = vrot.slane %v713_v6, 1  ;;  %v1542_v35 = vmul.f32 %v3466_v47, %v713_v6  ;;  %v1380_v12 = vadd.f32 %v3818_v23, %v3677_v9  ;;  %v4919_v6 = vld [vmem:[#allocation34_spill] sm:$0xff] }
 0x1d5   : > { %4909 = vst [vmem:[#allocation78_spill] sm:$0xff] %v4062_v16  ;;  %v714_v56 = vmul.f32 %v3613_v57, %v709_v42  ;;  %v1436_v33 = vadd.f32 %v3747_v27, %v3822_v60  ;;  %v1489_v43 = vadd.f32 %v3756_v30, %v3851_v29  ;;  %v1508_v63 = vmul.f32 %v3538_v20, %v3834_v36 }
 0x1d6   : > { %v1153_v8 = vsel %vm1116_vm5, %v1150_v49, %v1152_v24  ;;  %v4074_v13 = vsel %vm1197_vm10, %v1231_v45, %v1233_v51  ;;  %v4910_v26 = vand.u32 15, %v3631_v2  ;;  %v1263_v45 = vmul.f32 %v3593_v52, %v3779_v7 }
 0x1d7   : > { %v1195_v9 = vmul.f32 %v3618_v58, %v1153_v8  ;;  %v1154_v27 = vrot.slane %v714_v56, 7  ;;  %v1235_v60 = vrot.slane %v714_v56, 1  ;;  %v4913_v49 = vand.u32 15, %v3634_v3  ;;  %v4920_v3 = vld [vmem:[#allocation24_spill] sm:$0xff]  ;;  %v4923_v8 = vld [vmem:[#allocation30_spill] sm:$0xff] }
 0x1d8   : > { %vm4082_vm2 = vcmp.le.s32.totalorder %v4910_v26, 14  ;;  %v4916_v36 = vand.u32 15, %v3637_v4  ;;  %v1543_v29 = vmul.f32 %v3466_v47, %v714_v56  ;;  %v1472_v58 = vadd.f32 %v1456_v10, %v1436_v33 }
 0x1d9   : > { %vm4091_vm3 = vcmp.le.s32.totalorder %v4913_v49, 14  ;;  %v1509_v5 = vmul.f32 %v3538_v20, %v3668_v54  ;;  %v1544_v52 = vadd.f32 %v4919_v6, %v1508_v63  ;;  %v4107_v7 = vmul.f32 %v4920_v3, %v3829_v17  ;;  %v4924_v63 = vld [vmem:[#allocation36_spill] sm:$0xff] }
 0x1da   : > { %vm4097_vm4 = vcmp.le.s32.totalorder %v4916_v36, 14  ;;  %v1522_v42 = vmul.f32 %v3538_v20, %v1195_v9  ;;  %v1155_v4 = vsel %vm1116_vm5, %v1152_v24, %v1154_v27  ;;  %v4112_v25 = vsel %vm1197_vm10, %v1233_v51, %v1235_v60  ;;  %v4925_v9 = vld [vmem:[#allocation25_spill] sm:$0xff]  ;;  %v4926_v49 = vld [vmem:[#allocation32_spill] sm:$0xff] }
 0x1db   : > { %4921 = vst [vmem:[#allocation34_spill] sm:$0xff] %v4112_v25  ;;  %v1257_v28 = vsel %vm1197_vm10, %v1235_v60, 0.0  ;;  %v1523_v10 = vmul.f32 %v3538_v20, %v1155_v4  ;;  %v1458_v54 = vmul.f32 %v3483_v1, %v4060_v34  ;;  %v1488_v56 = vadd.f32 %v1472_v58, %v1380_v12  ;;  %v4927_v36 = vld [vmem:[#allocation33_spill] sm:$0xff] }
 0x1dc   : > { %v4118_v33 = vadd.f32 %v1542_v35, %v1522_v42  ;;  %v1277_v17 = vmul.f32 %v4923_v8, %v1257_v28  ;;  %v1545_v26 = vadd.f32 %v4924_v63, %v1509_v5  ;;  %v1564_v24 = vmul.f32 %v4925_v9, %v4060_v34  ;;  %v4931_v8 = vld [vmem:[#allocation29_spill] sm:$0xff] }
 0x1dd   : > { %v1559_v27 = vadd.f32 %v1543_v29, %v1523_v10  ;;  %v1565_v51 = vmul.f32 %v4925_v9, %v1263_v45  ;;  %v1382_v60 = vadd.f32 %v3818_v23, %v4926_v49  ;;  %v1438_v6 = vadd.f32 %v4927_v36, %v1402_v40 }
 0x1de   : > { %4922 = vst [vmem:[#allocation24_spill] sm:$0xff] %v4118_v33  ;;  %v1579_v3 = vmul.f32 %v4925_v9, %v1277_v17  ;;  %v1580_v12 = vadd.f32 %v1564_v24, %v1544_v52  ;;  %v1459_v35 = vmul.f32 %v3483_v1, %v1263_v45  ;;  %v1566_v58 = vmul.f32 %v4925_v9, %v3805_v15 }
 0x1df   : > { %v1581_v5 = vadd.f32 %v1565_v51, %v1545_v26  ;;  %v1474_v42 = vadd.f32 %v1458_v54, %v1438_v6  ;;  %v1567_v29 = vmul.f32 %v4925_v9, %v4107_v7  ;;  %v4928_v4 = vrot.slane %v3739_v44, 1  ;;  %v4932_v54 = vld [vmem:[#allocation48_spill] sm:$0xff] }
 0x1e0   : > { %v4929_v28 = vrot.slane %v3731_v0, 1  ;;  %v4141_v40 = vadd.f32 %v1579_v3, %v1559_v27  ;;  %v1596_v52 = vadd.f32 %v1580_v12, %v1488_v56  ;;  %v1475_v17 = vadd.f32 %v1459_v35, %v4931_v8  ;;  %v4936_v12 = vld [vmem:[#allocation20_spill] sm:$0xff] }
 0x1e1   : > { %v1582_v63 = vadd.f32 %v1566_v58, %v3811_v19  ;;  %v1597_v24 = vadd.f32 %v1581_v5, %v1489_v43  ;;  %v1490_v26 = vadd.f32 %v1474_v42, %v1382_v60  ;;  %v1583_v51 = vadd.f32 %v1567_v29, %v4932_v54  ;;  %v4935_v60 = vld [vmem:[#allocation21_spill] sm:$0xff]  ;;  %v4937_v42 = vld [vmem:[#allocation38_spill] sm:$0xff]  ;;  %v4938_v29 = vld [vmem:[#allocation23_spill] sm:$0xff] }
 0x1e2   : > { %v4139_v10 = vsel %vm1197_vm10, %v4929_v28, %v4928_v4  ;;  %4930 = vst [vmem:[#allocation30_spill] sm:$0xff] %v4141_v40  ;;  %v1628_v49 = vmul.f32 0.70710677, %v1596_v52  ;;  %v1491_v36 = vadd.f32 %v1475_v17, %v1383_v11  ;;  %v4933_v6 = vmov 0.0   ;;  %v4934_v4 = vld [vmem:[#allocation31_spill] sm:$0xff]  ;;  %v4939_v8 = vld [vmem:[#allocation44_spill] sm:$0xff] }
 0x1e3   : > { %v2416_v33 = vsel %vm4082_vm2, 1.0, %v4933_v6  ;;  %v1332_v28 = vadd.f32 %v4934_v4, %v3939_v22  ;;  %v1629_v27 = vmul.f32 0.70710677, %v1597_v24  ;;  %v1598_v3 = vadd.f32 %v1582_v63, %v1490_v26  ;;  %v4940_v63 = vld [vmem:[#allocation26_spill] sm:$0xff]  ;;  %v4941_v4 = vld [vmem:[#allocation28_spill] sm:$0xff] }
 0x1e4   : > { %v4154_v56 = vsel %vm4091_vm3, 1.0, %v4933_v6  ;;  %v4159_v19 = vsel %vm4097_vm4, 1.0, %v4933_v6  ;;  %v1676_v11 = vand.u32 2147483647, %v1628_v49  ;;  %v1599_v43 = vadd.f32 %v1583_v51, %v1491_v36 }
 0x1e5   : > { %v1353_v57 = vmul.f32 %v4935_v60, %v1263_v45  ;;  %v4163_v35 = vadd.s32 120, %v4936_v12  ;;  %v4167_v22 = vmul.f32 %v3463_v46, %v3731_v0  ;;  %v1532_v30 = vmul.f32 %v3466_v47, %v3731_v0 }
 0x1e6   : > { %v1677_v58 = vand.u32 2147483647, %v1629_v27  ;;  %v1352_v2 = vmul.f32 %v4935_v60, %v4060_v34  ;;  %v1533_v5 = vmul.f32 %v3466_v47, %v3739_v44  ;;  %v4177_v45 = vmul.f32 %v4938_v29, %v4937_v42 }
 0x1e7   : > { %v4181_v17 = vmul.f32 %v3466_v47, %v4939_v8  ;;  %v1692_v46 = vmul.f32 0.3275911, %v1676_v11  ;;  %v4185_v26 = vmul.f32 %v4940_v63, %v3935_v55  ;;  %v4187_v54 = vmul.f32 0.70710677, %v1598_v3  ;;  %v4942_v55 = vld [vmem:[#allocation27_spill] sm:$0xff] }
 0x1e8   : > { %v1693_v0 = vmul.f32 0.3275911, %v1677_v58  ;;  %v1368_v34 = vadd.f32 %v1352_v2, %v1332_v28  ;;  %v4191_v44 = vmul.f32 %v3466_v47, %v3872_v31  ;;  %v4193_v36 = vmul.f32 0.70710677, %v1599_v43  ;;  %v4943_v28 = vld [vmem:[#allocation52_spill] sm:$0xff] }
 0x1e9   : > { %v1708_v51 = vadd.f32 1.0, %v1692_v46  ;;  %v1369_v42 = vadd.f32 %v1353_v57, %v4941_v4  ;;  %vm1644_vm5 = vcmp.ge.f32.partialorder %v1628_v49, 0.0  ;;  %v1884_v40 = vsub.f32 0.0, %v1676_v11 }
 0x1ea   : > { %v1709_v29 = vadd.f32 1.0, %v1693_v0  ;;  %v1678_v38 = vand.u32 2147483647, %v4187_v54  ;;  %v4199_v63 = vmul.f32 %v4942_v55, %v4074_v13  ;;  %vm1645_vm6 = vcmp.ge.f32.partialorder %v1629_v27, 0.0 }
 0x1eb   : > { %2765 = vrcp.f32 %v1708_v51  ;;  %v4202_v2 = vmul.f32 %v2416_v33, %v4943_v28  ;;  %v4204_v47 = vmul.f32 0.5, %v1596_v52  ;;  %v1885_v46 = vsub.f32 0.0, %v1677_v58 }
 0x1ec   : > { %2767 = vrcp.f32 %v1709_v29  ;;  %v1679_v57 = vand.u32 2147483647, %v4193_v36  ;;  %v4207_v49 = vmul.f32 0.5, %v1597_v24  ;;  %v4782_v0 = vmov -1.0  }
 0x1ed   : > { %v4210_v4 = vsel %vm1644_vm5, 1.0, %v4782_v0  ;;  %v4212_v21 = vmul.f32 0.5, %v1598_v3  ;;  %v1694_v13 = vmul.f32 0.3275911, %v1678_v38  ;;  %v4215_v27 = vsel %vm1645_vm6, 1.0, %v4782_v0  ;;  %v4944_v0 = vld [vmem:[#allocation37_spill] sm:$0xff] }
 0x1ee   : > { %v1900_v33 = vmul.f32 %v1884_v40, %v1676_v11  ;;  %v4217_v51 = vmul.f32 0.5, %v1599_v43  ;;  %v1695_v52 = vmul.f32 0.3275911, %v1679_v57  ;;  %v1385_v55 = vadd.f32 %v3818_v23, %v1369_v42  ;;  %v4945_v43 = vld [vmem:[#allocation40_spill] sm:$0xff] }
 0x1ef   : > { %v1710_v29 = vadd.f32 1.0, %v1694_v13  ;;  %v1460_v24 = vmul.f32 %v3483_v1, %v3805_v15  ;;  %v1461_v28 = vmul.f32 %v3483_v1, %v4107_v7  ;;  %v1901_v18 = vmul.f32 %v1885_v46, %v1677_v58  ;;  %v4946_v13 = vld [vmem:[#allocation46_spill] sm:$0xff] }
 0x1f0   : > { %v1711_v3 = vadd.f32 1.0, %v1695_v52  ;;  %v1512_v16 = vmul.f32 %v3538_v20, %v4177_v45  ;;  %v1513_v40 = vmul.f32 %v3538_v20, %v4944_v0  ;;  %vm1646_vm7 = vcmp.ge.f32.partialorder %v4187_v54, 0.0 }
 0x1f1   : > { %2769 = vrcp.f32 %v1710_v29  ;;  %v1384_v11 = vadd.f32 %v3818_v23, %v1368_v34  ;;  %v1476_v42 = vadd.f32 %v1460_v24, %v4945_v43  ;;  %v1477_v62 = vadd.f32 %v1461_v28, %v4946_v13 }
 0x1f2   : > { %2771 = vrcp.f32 %v1711_v3  ;;  %v1886_v50 = vsub.f32 0.0, %v1678_v38  ;;  %v1548_v25 = vadd.f32 %v1532_v30, %v1512_v16  ;;  %v1549_v58 = vadd.f32 %v1533_v5, %v1513_v40 }
 0x1f3   : > { %v1916_v46 = vmul.f32 1.442695, %v1900_v33  ;;  %v1492_v52 = vadd.f32 %v1476_v42, %v1384_v11  ;;  %v1493_v12 = vadd.f32 %v1477_v62, %v1385_v55  ;;  %v1568_v41 = vmul.f32 %v4925_v9, %v4139_v10  ;;  %v4950_v11 = vld [vmem:[#allocation45_spill] sm:$0xff] }
 0x1f4   : > { %v1918_v0 = vmul.f32 1.442695, %v1901_v18  ;;  %v1887_v59 = vsub.f32 0.0, %v1679_v57  ;;  %v1569_v29 = vmul.f32 %v4925_v9, %v4202_v2  ;;  %v4947_v34 = vrot.slane %v3872_v31, 1 }
 0x1f5   : > { %v4948_v24 = vrot.slane %v4939_v8, 1  ;;  %v4243_v16 = vpop.eup %2765  ;;  %v1584_v30 = vadd.f32 %v1568_v41, %v1548_v25  ;;  %v1354_v62 = vmul.f32 %v4935_v60, %v3805_v15  ;;  %v1355_v18 = vmul.f32 %v4935_v60, %v4107_v7  ;;  %v4949_v15 = vld [vmem:[#allocation39_spill] sm:$0xff] }
 0x1f6   : > { %v1406_v5 = vmul.f32 %v3478_v61, %v4177_v45  ;;  %v4251_v33 = vpop.eup %2767  ;;  %v1740_v31 = vmul.f32 1.0614054, %v4243_v16  ;;  %v1902_v8 = vmul.f32 %v1886_v50, %v1678_v38  ;;  %v1585_v55 = vadd.f32 %v1569_v29, %v1549_v58 }
 0x1f7   : > { %v4241_v28 = vsel %vm1197_vm10, %v4948_v24, %v4947_v34  ;;  %v1463_v3 = vmul.f32 %v3483_v1, %v4202_v2  ;;  %v1741_v41 = vmul.f32 1.0614054, %v4251_v33  ;;  %v4257_v25 = vadd.f32 %v1584_v30, %v1492_v52  ;;  %v4951_v34 = vld [vmem:[#allocation42_spill] sm:$0xff] }
 0x1f8   : > { %v1370_v40 = vadd.f32 %v1354_v62, %v4949_v15  ;;  %v1371_v7 = vadd.f32 %v1355_v18, %v4950_v11  ;;  %v1756_v43 = vadd.f32 -1.4531521, %v1740_v31  ;;  %v4261_v42 = vadd.f32 %v1585_v55, %v1493_v12 }
 0x1f9   : > { %v1442_v13 = vadd.f32 %v4167_v22, %v1406_v5  ;;  %v1479_v24 = vadd.f32 %v1463_v3, %v4951_v34  ;;  %v1757_v50 = vadd.f32 -1.4531521, %v1741_v41  ;;  %v1903_v38 = vmul.f32 %v1887_v59, %v1679_v57 }
 0x1fa   : > { %v4266_v58 = vmul.f32 0.70710677, %v4257_v25  ;;  %v1462_v52 = vmul.f32 %v3483_v1, %v4139_v10  ;;  %v1772_v29 = vmul.f32 %v4243_v16, %v1756_v43  ;;  %vm1647_vm8 = vcmp.ge.f32.partialorder %v4193_v36, 0.0 }
 0x1fb   : > { %v1920_v30 = vmul.f32 1.442695, %v1902_v8  ;;  %v4273_v12 = vmul.f32 0.70710677, %v4261_v42  ;;  %v4275_v62 = vpop.eup %2769  ;;  %v1773_v22 = vmul.f32 %v4251_v33, %v1757_v50  ;;  %v1386_v57 = vadd.f32 %v3818_v23, %v1370_v40 }
 0x1fc   : > { %v1680_v59 = vand.u32 2147483647, %v4266_v58  ;;  %v1478_v18 = vadd.f32 %v1462_v52, %v1442_v13  ;;  %v4280_v5 = vpop.eup %2771  ;;  %v1788_v31 = vadd.f32 1.4214138, %v1772_v29  ;;  %2773 = vpow2.f32 %v1916_v46 }
 0x1fd   : > { %v4952_v55 = vmov -1.0   ;;  %v1742_v3 = vmul.f32 1.0614054, %v4275_v62  ;;  %v1789_v41 = vadd.f32 1.4214138, %v1773_v22  ;;  %2775 = vpow2.f32 %v1918_v0 }
 0x1fe   : > { %v4285_v8 = vsel %vm1646_vm7, 1.0, %v4952_v55  ;;  %v1743_v15 = vmul.f32 1.0614054, %v4280_v5  ;;  %v1922_v11 = vmul.f32 1.442695, %v1903_v38  ;;  %v1804_v43 = vmul.f32 %v4243_v16, %v1788_v31 }
 0x1ff   : > { %v1758_v40 = vadd.f32 -1.4531521, %v1742_v3  ;;  %v4291_v13 = vand.u32 2147483647, %v4273_v12  ;;  %v1696_v34 = vmul.f32 0.3275911, %v1680_v59  ;;  %v1805_v46 = vmul.f32 %v4251_v33, %v1789_v41 }
 0x200   : > { %v1759_v50 = vadd.f32 -1.4531521, %v1743_v15  ;;  %2777 = vpow2.f32 %v1920_v30  ;;  %v1494_v54 = vadd.f32 %v1478_v18, %v1386_v57  ;;  %v1820_v52 = vadd.f32 -0.28449672, %v1804_v43 }
 0x201   : > { %v1774_v29 = vmul.f32 %v4275_v62, %v1758_v40  ;;  %v1697_v0 = vmul.f32 0.3275911, %v4291_v13  ;;  %v1712_v22 = vadd.f32 1.0, %v1696_v34  ;;  %v1821_v32 = vadd.f32 -0.28449672, %v1805_v46  ;;  %v4953_v46 = vld [vmem:[#allocation53_spill] sm:$0xff] }
 0x202   : > { %v1775_v38 = vmul.f32 %v4280_v5, %v1759_v50  ;;  %v1888_v31 = vsub.f32 0.0, %v1680_v59  ;;  %v1387_v3 = vadd.f32 %v3818_v23, %v1371_v7  ;;  %v1836_v14 = vmul.f32 %v4243_v16, %v1820_v52 }
 0x203   : > { %v1790_v61 = vadd.f32 1.4214138, %v1774_v29  ;;  %v1713_v6 = vadd.f32 1.0, %v1697_v0  ;;  %2779 = vrcp.f32 %v1712_v22  ;;  %v1837_v30 = vmul.f32 %v4251_v33, %v1821_v32 }
 0x204   : > { %v1791_v57 = vadd.f32 1.4214138, %v1775_v38  ;;  %2781 = vpow2.f32 %v1922_v11  ;;  %v4302_v18 = vmul.f32 %v4154_v56, %v3950_v39  ;;  %v1852_v41 = vadd.f32 0.2548296, %v1836_v14 }
 0x205   : > { %v1806_v15 = vmul.f32 %v4275_v62, %v1790_v61  ;;  %2783 = vrcp.f32 %v1713_v6  ;;  %v1495_v43 = vadd.f32 %v1479_v24, %v1387_v3  ;;  %v1853_v40 = vadd.f32 0.2548296, %v1837_v30  ;;  %v4956_v30 = vld [vmem:[#allocation43_spill] sm:$0xff] }
 0x206   : > { %v1663_v7 = vsel %vm1647_vm8, 1.0, %v4952_v55  ;;  %v1807_v34 = vmul.f32 %v4280_v5, %v1791_v57  ;;  %v1514_v32 = vmul.f32 %v3538_v20, %v4953_v46  ;;  %v2774_v11 = vpop.eup %2773  ;;  %v1868_v50 = vmul.f32 %v4243_v16, %v1852_v41 }
 0x207   : > { %v1822_v39 = vadd.f32 -0.28449672, %v1806_v15  ;;  %v1904_v56 = vmul.f32 %v1888_v31, %v1680_v59  ;;  %v1515_v61 = vmul.f32 %v3538_v20, %v3932_v37  ;;  %v2776_v14 = vpop.eup %2775  ;;  %v1869_v6 = vmul.f32 %v4251_v33, %v1853_v40  ;;  %v4954_v33 = vld [vmem:[#allocation47_spill] sm:$0xff] }
 0x208   : > { %v1823_v24 = vadd.f32 -0.28449672, %v1807_v34  ;;  %v1550_v36 = vadd.f32 %v4181_v17, %v1514_v32  ;;  %v1570_v52 = vmul.f32 %v4925_v9, %v4241_v28  ;;  %v1948_v29 = vmul.f32 %v2774_v11, %v1868_v50 }
 0x209   : > { %v1838_v0 = vmul.f32 %v4275_v62, %v1822_v39  ;;  %v1551_v22 = vadd.f32 %v4191_v44, %v1515_v61  ;;  %v1571_v16 = vmul.f32 %v4925_v9, %v4302_v18  ;;  %v1949_v38 = vmul.f32 %v2776_v14, %v1869_v6 }
 0x20a   : > { %v2778_v59 = vpop.eup %2777  ;;  %v1839_v37 = vmul.f32 %v4280_v5, %v1823_v24  ;;  %v1586_v31 = vadd.f32 %v1570_v52, %v1550_v36  ;;  %v4955_v3 = vrot.slane %v4954_v33, 1  ;;  %v4957_v17 = vrot.slane %v4956_v30, 1 }
 0x20b   : > { %v1964_v41 = vsub.f32 1.0, %v1948_v29  ;;  %v1854_v15 = vadd.f32 0.2548296, %v1838_v0  ;;  %v1889_v40 = vsub.f32 0.0, %v4291_v13  ;;  %v1587_v44 = vadd.f32 %v1571_v16, %v1551_v22 }
 0x20c   : > { %v4328_v57 = vsel %vm1197_vm10, %v4957_v17, %v4955_v3  ;;  %v1965_v34 = vsub.f32 1.0, %v1949_v38  ;;  %v1855_v46 = vadd.f32 0.2548296, %v1839_v37  ;;  %v4332_v32 = vmul.f32 0.5, %v4257_v25 }
 0x20d   : > { %v4334_v11 = vadd.f32 %v1586_v31, %v1494_v54  ;;  %v4336_v50 = vpop.eup %2779  ;;  %v1980_v39 = vmul.f32 %v1964_v41, %v4210_v4  ;;  %v1870_v61 = vmul.f32 %v4275_v62, %v1854_v15  ;;  %v4341_v14 = vmul.f32 0.5, %v4261_v42 }
 0x20e   : > { %v4343_v6 = vadd.f32 %v1587_v44, %v1495_v43  ;;  %v2782_v24 = vpop.eup %2781  ;;  %v1981_v36 = vmul.f32 %v1965_v34, %v4215_v27  ;;  %v1871_v52 = vmul.f32 %v4280_v5, %v1855_v46  ;;  %v1744_v25 = vmul.f32 1.0614054, %v4336_v50 }
 0x20f   : > { %v1924_v54 = vmul.f32 1.442695, %v1904_v56  ;;  %v4348_v29 = vpop.eup %2783  ;;  %v1996_v0 = vadd.f32 1.0, %v1980_v39  ;;  %v1950_v22 = vmul.f32 %v2778_v59, %v1870_v61  ;;  %v1905_v4 = vmul.f32 %v1889_v40, %v4291_v13 }
 0x210   : > { %v4352_v62 = vmul.f32 0.70710677, %v4334_v11  ;;  %v1997_v42 = vadd.f32 1.0, %v1981_v36  ;;  %v1951_v43 = vmul.f32 %v2782_v24, %v1871_v52  ;;  %v1745_v16 = vmul.f32 1.0614054, %v4348_v29 }
 0x211   : > { %v1760_v38 = vadd.f32 -1.4531521, %v1744_v25  ;;  %v2012_v27 = vmul.f32 %v1996_v0, %v4204_v47  ;;  %v1966_v5 = vsub.f32 1.0, %v1950_v22  ;;  %vm1648_vm9 = vcmp.ge.f32.partialorder %v4266_v58, 0.0  ;;  %v4958_v0 = vld [vmem:[#allocation35_spill] sm:$0xff]  ;;  %v4959_v58 = vld [vmem:[#allocation66_spill] sm:$0xff] }
 0x212   : > { %v4358_v56 = vmul.f32 0.70710677, %v4343_v6  ;;  %v2013_v59 = vmul.f32 %v1997_v42, %v4207_v49  ;;  %v1967_v37 = vsub.f32 1.0, %v1951_v43  ;;  %v1761_v13 = vadd.f32 -1.4531521, %v1745_v16 }
 0x213   : > { %v1776_v31 = vmul.f32 %v4336_v50, %v1760_v38  ;;  %v1982_v33 = vmul.f32 %v1966_v5, %v4285_v8  ;;  %2785 = vpow2.f32 %v1924_v54  ;;  %v1926_v3 = vmul.f32 1.442695, %v1905_v4 }
 0x214   : > { %v1682_v30 = vand.u32 2147483647, %v4352_v62  ;;  %v2028_v17 = vpack.c.bf16 %v2013_v59, %v2012_v27  ;;  %v1983_v47 = vmul.f32 %v1967_v37, %v1663_v7  ;;  %v1777_v41 = vmul.f32 %v4348_v29, %v1761_v13 }
 0x215   : > { %v1792_v15 = vadd.f32 1.4214138, %v1776_v31  ;;  %v1998_v40 = vadd.f32 1.0, %v1982_v33  ;;  %v1683_v44 = vand.u32 2147483647, %v4358_v56  ;;  %v1300_v49 = vmul.f32 %v3468_v48, %v4177_v45  ;;  %v4960_v31 = vld [vmem:[#allocation41_spill] sm:$0xff] }
 0x216   : > { %v1698_v34 = vmul.f32 0.3275911, %v1682_v30  ;;  %2583 = vmatprep.mubr.bf16.mxu1 %v2028_v17  ;;  %v1999_v46 = vadd.f32 1.0, %v1983_v47  ;;  %vm1649_vm11 = vcmp.ge.f32.partialorder %v4273_v12, 0.0  ;;  %v1793_v8 = vadd.f32 1.4214138, %v1777_v41 }
 0x217   : > { %v1808_v39 = vmul.f32 %v4336_v50, %v1792_v15  ;;  %v2014_v61 = vmul.f32 %v1998_v40, %v4212_v21  ;;  %2787 = vpow2.f32 %v1926_v3  ;;  %v1699_v7 = vmul.f32 0.3275911, %v1683_v44  ;;  %v4961_v47 = vld [vmem:[#allocation59_spill] sm:$0xff] }
 0x218   : > { %v1714_v24 = vadd.f32 1.0, %v1698_v34  ;;  %v2015_v36 = vmul.f32 %v1999_v46, %v4217_v51  ;;  %v1664_v52 = vsel %vm1648_vm9, 1.0, %v4952_v55  ;;  %v1809_v45 = vmul.f32 %v4348_v29, %v1793_v8  ;;  %v4962_v34 = vld [vmem:[#allocation62_spill] sm:$0xff] }
 0x219   : > { %v1824_v25 = vadd.f32 -0.28449672, %v1808_v39  ;;  %v1715_v54 = vadd.f32 1.0, %v1699_v7  ;;  %v1336_v22 = vadd.f32 %v4958_v0, %v1300_v49  ;;  %v1356_v4 = vmul.f32 %v4935_v60, %v4139_v10  ;;  %v4963_v46 = vld [vmem:[#allocation54_spill] sm:$0xff]  ;;  %v4965_v0 = vld [vmem:[#allocation55_spill] sm:$0xff] }
 0x21a   : > { %2789 = vrcp.f32 %v1714_v24  ;;  %v2029_v21 = vpack.c.bf16 %v2015_v36, %v2014_v61  ;;  %v1665_v42 = vsel %vm1649_vm11, 1.0, %v4952_v55  ;;  %v1825_v51 = vadd.f32 -0.28449672, %v1809_v45 }
 0x21b   : > { %v1840_v43 = vmul.f32 %v4336_v50, %v1824_v25  ;;  %2791 = vrcp.f32 %v1715_v54  ;;  %v4385_v16 = vmul.f32 %v4159_v19, %v4959_v58  ;;  %v1357_v38 = vmul.f32 %v4935_v60, %v4202_v2 }
 0x21c   : > { %v1372_v27 = vadd.f32 %v1356_v4, %v1336_v22  ;;  %2584 = vmatmul.mubr.bf16.vlgmr.msra.gmra.mrb[4].mxu1 %v2029_v21  ;;  %v1841_v10 = vmul.f32 %v4348_v29, %v1825_v51  ;;  %v1890_v59 = vsub.f32 0.0, %v1682_v30  ;;  %v1464_v12 = vmul.f32 %v3483_v1, %v4241_v28 }
 0x21d   : > { %v1856_v5 = vadd.f32 0.2548296, %v1840_v43  ;;  %v2786_v37 = vpop.eup %2785  ;;  %v1891_v13 = vsub.f32 0.0, %v1683_v44  ;;  %v1373_v33 = vadd.f32 %v1357_v38, %v4960_v31  ;;  %v1465_v19 = vmul.f32 %v3483_v1, %v4302_v18  ;;  %v4967_v38 = vld [vmem:[#allocation60_spill] sm:$0xff] }
 0x21e   : > { %v1388_v3 = vadd.f32 %v3818_v23, %v1372_v27  ;;  %v1857_v17 = vadd.f32 0.2548296, %v1841_v10  ;;  %v1480_v41 = vadd.f32 %v1464_v12, %v4961_v47  ;;  %v1516_v15 = vmul.f32 %v3538_v20, %v4185_v26 }
 0x21f   : > { %v1872_v2 = vmul.f32 %v4336_v50, %v1856_v5  ;;  %v1389_v40 = vadd.f32 %v3818_v23, %v1373_v33  ;;  %v1481_v49 = vadd.f32 %v1465_v19, %v4962_v34  ;;  %v1517_v8 = vmul.f32 %v3538_v20, %v4963_v46  ;;  %v4964_v50 = vld [vmem:[#allocation51_spill] sm:$0xff] }
 0x220   : > { %v1572_v39 = vmul.f32 %v4925_v9, %v4328_v57  ;;  %v1873_v61 = vmul.f32 %v4348_v29, %v1857_v17  ;;  %v1496_v24 = vadd.f32 %v1480_v41, %v1388_v3  ;;  %v1552_v36 = vadd.f32 %v4964_v50, %v1516_v15 }
 0x221   : > { %v1952_v7 = vmul.f32 %v2786_v37, %v1872_v2  ;;  %v2788_v45 = vpop.eup %2787  ;;  %v1906_v25 = vmul.f32 %v1890_v59, %v1682_v30  ;;  %v1497_v54 = vadd.f32 %v1481_v49, %v1389_v40  ;;  %v1553_v22 = vadd.f32 %v4965_v0, %v1517_v8  ;;  %v4970_v2 = vld [vmem:[#allocation61_spill] sm:$0xff] }
 0x222   : > { %v1573_v4 = vmul.f32 %v4925_v9, %v4385_v16  ;;  %v1953_v21 = vmul.f32 %v2788_v45, %v1873_v61  ;;  %v1588_v43 = vadd.f32 %v1572_v39, %v1552_v36  ;;  %v4966_v58 = vrot.slane %v3967_v53, 1 }
 0x223   : > { %v1968_v51 = vsub.f32 1.0, %v1952_v7  ;;  %v4968_v27 = vrot.slane %v4967_v38, 1  ;;  %v1907_v5 = vmul.f32 %v1891_v13, %v1683_v44  ;;  %v1358_v59 = vmul.f32 %v4935_v60, %v4241_v28  ;;  %v4969_v44 = vld [vmem:[#allocation58_spill] sm:$0xff] }
 0x224   : > { %v4418_v10 = vpop.eup %2789  ;;  %v1589_v30 = vadd.f32 %v1573_v4, %v1553_v22  ;;  %v1359_v12 = vmul.f32 %v4935_v60, %v4302_v18  ;;  %v1969_v37 = vsub.f32 1.0, %v1953_v21  ;;  %v4425_v53 = vadd.f32 %v1588_v43, %v1496_v24 }
 0x225   : > { %v4416_v29 = vsel %vm1197_vm10, %v4968_v27, %v4966_v58  ;;  %v1984_v31 = vmul.f32 %v1968_v51, %v1664_v52  ;;  %v1746_v33 = vmul.f32 1.0614054, %v4418_v10  ;;  %v4427_v3 = vpop.eup %2791  ;;  %v845_v17 = vand.u32 15, %v4163_v35 }
 0x226   : > { %v4429_v19 = vadd.f32 %v1589_v30, %v1497_v54  ;;  %v1374_v13 = vadd.f32 %v1358_v59, %v4969_v44  ;;  %v1375_v47 = vadd.f32 %v1359_v12, %v4970_v2  ;;  %v1985_v28 = vmul.f32 %v1969_v37, %v1665_v42  ;;  %v4974_v59 = vld [vmem:[#allocation22_spill] sm:$0xff] }
 0x227   : > { %v2000_v41 = vadd.f32 1.0, %v1984_v31  ;;  %v1747_v18 = vmul.f32 1.0614054, %v4427_v3  ;;  %v1762_v15 = vadd.f32 -1.4531521, %v1746_v33  ;;  %v4444_v39 = vmul.f32 %v3483_v1, %v4199_v63  ;;  %v4975_v33 = vld [vmem:[#allocation73_spill] sm:$0xff] }
 0x228   : > { %v1928_v52 = vmul.f32 1.442695, %v1906_v25  ;;  %v4436_v40 = vmul.f32 0.70710677, %v4425_v53  ;;  %v4439_v34 = vmul.f32 0.70710677, %v4429_v19  ;;  %v1410_v12 = vmul.f32 %v4974_v59, %v4185_v26 }
 0x229   : > { %v2001_v49 = vadd.f32 1.0, %v1985_v28  ;;  %v1763_v46 = vadd.f32 -1.4531521, %v1747_v18  ;;  %v1778_v35 = vmul.f32 %v4418_v10, %v1762_v15  ;;  %v1930_v8 = vmul.f32 1.442695, %v1907_v5  ;;  %v4976_v44 = vld [vmem:[#allocation50_spill] sm:$0xff] }
 0x22a   : > { %v1684_v42 = vand.u32 2147483647, %v4436_v40  ;;  %v4448_v61 = vand.u32 2147483647, %v4439_v34  ;;  %vm4450_vm10 = vcmp.le.s32.totalorder %v845_v17, 14  ;;  %v2016_v24 = vmul.f32 %v2000_v41, %v4332_v32 }
 0x22b   : > { %v2017_v50 = vmul.f32 %v2001_v49, %v4341_v14  ;;  %v1779_v36 = vmul.f32 %v4427_v3, %v1763_v46  ;;  %v1794_v45 = vadd.f32 1.4214138, %v1778_v35  ;;  %2793 = vpow2.f32 %v1928_v52  ;;  %v4977_v49 = vld [vmem:[#allocation67_spill] sm:$0xff] }
 0x22c   : > { %v1700_v25 = vmul.f32 0.3275911, %v1684_v42  ;;  %v1701_v54 = vmul.f32 0.3275911, %v4448_v61  ;;  %v1892_v0 = vsub.f32 0.0, %v1684_v42  ;;  %v4459_v4 = vmul.f32 0.5, %v4334_v11 }
 0x22d   : > { %v2030_v22 = vpack.c.bf16 %v2017_v50, %v2016_v24  ;;  %v1795_v21 = vadd.f32 1.4214138, %v1779_v36  ;;  %v1810_v51 = vmul.f32 %v4418_v10, %v1794_v45  ;;  %2795 = vpow2.f32 %v1930_v8  ;;  %v4978_v8 = vld [vmem:[#allocation57_spill] sm:$0xff] }
 0x22e   : > { %v1716_v43 = vadd.f32 1.0, %v1700_v25  ;;  %v1717_v32 = vadd.f32 1.0, %v1701_v54  ;;  %v4973_v58 = vmov 0.0   ;;  %v4466_v38 = vmul.f32 0.5, %v4343_v6  ;;  %v4980_v45 = vld [vmem:[#allocation65_spill] sm:$0xff] }
 0x22f   : > { %v2419_v14 = vsel %vm4450_vm10, 1.0, %v4973_v58  ;;  %2587 = vmatprep.mubr.bf16.mxu1 %v2030_v22  ;;  %vm1650_vm12 = vcmp.ge.f32.partialorder %v4352_v62, 0.0  ;;  %v1811_v27 = vmul.f32 %v4427_v3, %v1795_v21  ;;  %v1826_v11 = vadd.f32 -0.28449672, %v1810_v51  ;;  %v4981_v22 = vld [vmem:[#allocation76_spill] sm:$0xff] }
 0x230   : > { %2797 = vrcp.f32 %v1716_v43  ;;  %v1893_v5 = vsub.f32 0.0, %v4448_v61  ;;  %v1908_v30 = vmul.f32 %v1892_v0, %v1684_v42  ;;  %v4475_v17 = vmul.f32 %v2419_v14, %v4975_v33  ;;  %v4982_v51 = vld [vmem:[#allocation20_spill] sm:$0xff] }
 0x231   : > { %v1827_v37 = vadd.f32 -0.28449672, %v1811_v27  ;;  %v1842_v31 = vmul.f32 %v4418_v10, %v1826_v11  ;;  %2799 = vrcp.f32 %v1717_v32  ;;  %v1390_v6 = vadd.f32 %v3818_v23, %v1374_v13  ;;  %v4979_v13 = vld [vmem:[#allocation69_spill] sm:$0xff] }
 0x232   : > { %v1446_v2 = vadd.f32 %v4976_v44, %v1410_v12  ;;  %v1466_v28 = vmul.f32 %v3483_v1, %v4328_v57  ;;  %v1467_v41 = vmul.f32 %v3483_v1, %v4385_v16  ;;  %v1391_v52 = vadd.f32 %v3818_v23, %v1375_v47 }
 0x233   : > { %v1843_v18 = vmul.f32 %v4427_v3, %v1827_v37  ;;  %v1858_v15 = vadd.f32 0.2548296, %v1842_v31  ;;  %v1518_v46 = vmul.f32 %v3538_v20, %v4977_v49  ;;  %v1519_v7 = vmul.f32 %v3538_v20, %v4979_v13 }
 0x234   : > { %v1482_v35 = vadd.f32 %v1466_v28, %v1446_v2  ;;  %v1483_v42 = vadd.f32 %v1467_v41, %v4978_v8  ;;  %v1574_v24 = vmul.f32 %v4925_v9, %v4416_v29  ;;  %v1575_v23 = vmul.f32 %v4925_v9, %v4475_v17  ;;  %v4983_v2 = vld [vmem:[#allocation49_spill] sm:$0xff] }
 0x235   : > { %v1859_v50 = vadd.f32 0.2548296, %v1843_v18  ;;  %v1874_v36 = vmul.f32 %v4418_v10, %v1858_v15  ;;  %v1554_v25 = vadd.f32 %v4980_v45, %v1518_v46  ;;  %v2794_v47 = vpop.eup %2793  ;;  %v1555_v21 = vadd.f32 %v4981_v22, %v1519_v7  ;;  %v4984_v18 = vld [vmem:[#allocation56_spill] sm:$0xff] }
 0x236   : > { %v1498_v54 = vadd.f32 %v1482_v35, %v1390_v6  ;;  %v1499_v0 = vadd.f32 %v1483_v42, %v1391_v52  ;;  %v732_v43 = vadd.s32 128, %v4982_v51  ;;  %v1304_v11 = vmul.f32 %v3468_v48, %v4185_v26 }
 0x237   : > { %v1875_v32 = vmul.f32 %v4427_v3, %v1859_v50  ;;  %v1954_v14 = vmul.f32 %v2794_v47, %v1874_v36  ;;  %v1590_v27 = vadd.f32 %v1574_v24, %v1554_v25  ;;  %v2796_v10 = vpop.eup %2795  ;;  %vm1651_vm13 = vcmp.ge.f32.partialorder %v4358_v56, 0.0  ;;  %v4985_v24 = vld [vmem:[#allocation34_spill] sm:$0xff] }
 0x238   : > { %v1591_v12 = vadd.f32 %v1575_v23, %v1555_v21  ;;  %v852_v37 = vand.u32 15, %v732_v43  ;;  %v1361_v31 = vmul.f32 %v4935_v60, %v4385_v16  ;;  %v1340_v28 = vadd.f32 %v4983_v2, %v1304_v11 }
 0x239   : > { %v1955_v33 = vmul.f32 %v2796_v10, %v1875_v32  ;;  %v1970_v6 = vsub.f32 1.0, %v1954_v14  ;;  %v4504_v44 = vadd.f32 %v1590_v27, %v1498_v54  ;;  %v1666_v48 = vsel %vm1650_vm12, 1.0, %v4952_v55 }
 0x23a   : > { %v4507_v3 = vpop.eup %2797  ;;  %v1909_v26 = vmul.f32 %v1893_v5, %v4448_v61  ;;  %v4513_v41 = vadd.f32 %v1591_v12, %v1499_v0  ;;  %v1377_v15 = vadd.f32 %v1361_v31, %v4984_v18  ;;  %v1932_v35 = vmul.f32 1.442695, %v1908_v30 }
 0x23b   : > { %v4516_v52 = vpop.eup %2799  ;;  %v1971_v16 = vsub.f32 1.0, %v1955_v33  ;;  %v1986_v49 = vmul.f32 %v1970_v6, %v1666_v48  ;;  %v1748_v46 = vmul.f32 1.0614054, %v4507_v3  ;;  %v1667_v8 = vsel %vm1651_vm13, 1.0, %v4952_v55  ;;  %v4552_v48 = vld [vmem:[%s4865_s3] ss:$0 sm:$0xff] }
 0x23c   : > { %v1749_v62 = vmul.f32 1.0614054, %v4516_v52  ;;  %v4524_v42 = vmul.f32 0.70710677, %v4504_v44  ;;  %vm992_vm14 = vcmp.ge.s32.totalorder %v852_v37, 1  ;;  %v4531_v50 = vmul.f32 %v4925_v9, %v4985_v24  ;;  %v4986_v37 = vld [vmem:[#allocation72_spill] sm:$0xff] }
 0x23d   : > { %v1987_v61 = vmul.f32 %v1971_v16, %v1667_v8  ;;  %v2002_v5 = vadd.f32 1.0, %v1986_v49  ;;  %v1764_v13 = vadd.f32 -1.4531521, %v1748_v46  ;;  %v4527_v7 = vmul.f32 0.70710677, %v4513_v41  ;;  %v4987_v46 = vld [vmem:[#allocation75_spill] sm:$0xff] }
 0x23e   : > { %v1765_v30 = vadd.f32 -1.4531521, %v1749_v62  ;;  %v1934_v36 = vmul.f32 1.442695, %v1909_v26  ;;  %v1686_v56 = vand.u32 2147483647, %v4524_v42  ;;  %2801 = vpow2.f32 %v1932_v35 }
 0x23f   : > { %v2003_v45 = vadd.f32 1.0, %v1987_v61  ;;  %v2018_v25 = vmul.f32 %v2002_v5, %v4459_v4  ;;  %v1780_v23 = vmul.f32 %v4507_v3, %v1764_v13  ;;  %v1687_v54 = vand.u32 2147483647, %v4527_v7  ;;  %v4988_v5 = vld [vmem:[#allocation78_spill] sm:$0xff]  ;;  %v4989_v24 = vld [vmem:[#allocation68_spill] sm:$0xff] }
 0x240   : > { %v1781_v47 = vmul.f32 %v4516_v52, %v1765_v30  ;;  %v2410_v0 = vsel %vm992_vm14, 1.0, %v4973_v58  ;;  %v1360_v22 = vmul.f32 %v4935_v60, %v4328_v57  ;;  %v1702_v43 = vmul.f32 0.3275911, %v1686_v56 }
 0x241   : > { %v2019_v21 = vmul.f32 %v2003_v45, %v4466_v38  ;;  %v1796_v51 = vadd.f32 1.4214138, %v1780_v23  ;;  %v1894_v32 = vsub.f32 0.0, %v1686_v56  ;;  %2803 = vpow2.f32 %v1934_v36  ;;  %v4990_v45 = vld [vmem:[#allocation64_spill] sm:$0xff] }
 0x242   : > { %v1797_v14 = vadd.f32 1.4214138, %v1781_v47  ;;  %v1703_v4 = vmul.f32 0.3275911, %v1687_v54  ;;  %v1376_v27 = vadd.f32 %v1360_v22, %v1340_v28  ;;  %vm1652_vm15 = vcmp.ge.f32.partialorder %v4436_v40, 0.0 }
 0x243   : > { %v2031_v11 = vpack.c.bf16 %v2019_v21, %v2018_v25  ;;  %v1812_v10 = vmul.f32 %v4507_v3, %v1796_v51  ;;  %v1718_v12 = vadd.f32 1.0, %v1702_v43  ;;  %v1193_v58 = vmul.f32 %v2410_v0, %v4986_v37  ;;  %v4991_v51 = vld [vmem:[#allocation71_spill] sm:$0xff] }
 0x244   : > { %vm1653_vm0 = vcmp.ge.f32.partialorder %v4439_v34, 0.0  ;;  %v1813_v57 = vmul.f32 %v4516_v52, %v1797_v14  ;;  %v1719_v38 = vadd.f32 1.0, %v1703_v4  ;;  %v1895_v31 = vsub.f32 0.0, %v1687_v54 }
 0x245   : > { %2588 = vmatmul.mubr.bf16.gmra.mrb[8].mxu1 %v2031_v11  ;;  %v1828_v33 = vadd.f32 -0.28449672, %v1812_v10  ;;  %2805 = vrcp.f32 %v1718_v12  ;;  %v1910_v6 = vmul.f32 %v1894_v32, %v1686_v56  ;;  %v1468_v2 = vmul.f32 %v3483_v1, %v4416_v29  ;;  %v4994_v10 = vld [vmem:[#allocation70_spill] sm:$0xff] }
 0x246   : > { %v1829_v28 = vadd.f32 -0.28449672, %v1813_v57  ;;  %2807 = vrcp.f32 %v1719_v38  ;;  %v1393_v26 = vadd.f32 %v4552_v48, %v1377_v15  ;;  %v1469_v18 = vmul.f32 %v3483_v1, %v4475_v17  ;;  %v4996_v57 = vld [vmem:[#allocation24_spill] sm:$0xff] }
 0x247   : > { %v1844_v16 = vmul.f32 %v4507_v3, %v1828_v33  ;;  %v1392_v49 = vadd.f32 %v4552_v48, %v1376_v27  ;;  %v1484_v35 = vadd.f32 %v1468_v2, %v4987_v46  ;;  %v1520_v8 = vmul.f32 %v3538_v20, %v1193_v58  ;;  %v4992_v27 = vld [vmem:[#allocation74_spill] sm:$0xff] }
 0x248   : > { %v1845_v62 = vmul.f32 %v4516_v52, %v1829_v28  ;;  %v1911_v61 = vmul.f32 %v1895_v31, %v1687_v54  ;;  %v1485_v13 = vadd.f32 %v1469_v18, %v4988_v5  ;;  %v1576_v30 = vmul.f32 %v4925_v9, %v4989_v24  ;;  %v2802_v15 = vpop.eup %2801 }
 0x249   : > { %v1860_v36 = vadd.f32 0.2548296, %v1844_v16  ;;  %v1500_v56 = vadd.f32 %v1484_v35, %v1392_v49  ;;  %v1556_v25 = vadd.f32 %v4990_v45, %v1520_v8  ;;  %v1577_v23 = vmul.f32 %v4925_v9, %v4199_v63  ;;  %v4993_v63 = vld [vmem:[#allocation77_spill] sm:$0xff] }
 0x24a   : > { %v1861_v47 = vadd.f32 0.2548296, %v1845_v62  ;;  %v1501_v0 = vadd.f32 %v1485_v13, %v1393_v26  ;;  %v1362_v20 = vmul.f32 %v4935_v60, %v4416_v29  ;;  %v1363_v54 = vmul.f32 %v4935_v60, %v4475_v17  ;;  %v4995_v17 = vld [vmem:[#allocation63_spill] sm:$0xff] }
 0x24b   : > { %v1876_v22 = vmul.f32 %v4507_v3, %v1860_v36  ;;  %v1592_v21 = vadd.f32 %v1576_v30, %v1556_v25  ;;  %v1593_v43 = vadd.f32 %v1577_v23, %v4991_v51  ;;  %v1414_v32 = vmul.f32 %v4974_v59, %v1193_v58  ;;  %v2804_v14 = vpop.eup %2803 }
 0x24c   : > { %v1877_v4 = vmul.f32 %v4516_v52, %v1861_v47  ;;  %v1378_v9 = vadd.f32 %v1362_v20, %v4992_v27  ;;  %v1379_v11 = vadd.f32 %v1363_v54, %v4993_v63  ;;  %v1487_v29 = vadd.f32 %v4444_v39, %v4994_v10  ;;  %v4997_v27 = vld [vmem:[#allocation30_spill] sm:$0xff] }
 0x24d   : > { %v1956_v12 = vmul.f32 %v2802_v15, %v1876_v22  ;;  %v4580_v37 = vadd.f32 %v1592_v21, %v1500_v56  ;;  %v4582_v60 = vadd.f32 %v1593_v43, %v1501_v0  ;;  %v1450_v3 = vadd.f32 %v4995_v17, %v1414_v32 }
 0x24e   : > { %v1470_v59 = vmul.f32 %v3483_v1, %v4989_v24  ;;  %v1668_v52 = vsel %vm1652_vm15, 1.0, %v4952_v55  ;;  %v1957_v58 = vmul.f32 %v2804_v14, %v1877_v4  ;;  %v1594_v38 = vadd.f32 %v4531_v50, %v4996_v57 }
 0x24f   : > { %v2806_v31 = vpop.eup %2805  ;;  %v1669_v39 = vsel %vm1653_vm0, 1.0, %v4952_v55  ;;  %v1972_v33 = vsub.f32 1.0, %v1956_v12  ;;  %v1936_v2 = vmul.f32 1.442695, %v1910_v6  ;;  %v4596_v28 = vmul.f32 0.70710677, %v4580_v37 }
 0x250   : > { %v2808_v26 = vpop.eup %2807  ;;  %v1973_v1 = vsub.f32 1.0, %v1957_v58  ;;  %v1750_v18 = vmul.f32 1.0614054, %v2806_v31  ;;  %v4599_v40 = vmul.f32 0.70710677, %v4582_v60  ;;  %v1486_v16 = vadd.f32 %v1470_v59, %v1450_v3 }
 0x251   : > { %v1988_v49 = vmul.f32 %v1972_v33, %v1668_v52  ;;  %v1751_v46 = vmul.f32 1.0614054, %v2808_v26  ;;  %v1938_v50 = vmul.f32 1.442695, %v1911_v61  ;;  %v1688_v35 = vand.u32 2147483647, %v4596_v28 }
 0x252   : > { %v1620_v34 = vmul.f32 0.5, %v4425_v53  ;;  %v1621_v8 = vmul.f32 0.5, %v4429_v19  ;;  %v1989_v6 = vmul.f32 %v1973_v1, %v1669_v39  ;;  %v1766_v62 = vadd.f32 -1.4531521, %v1750_v18 }
 0x253   : > { %v2004_v5 = vadd.f32 1.0, %v1988_v49  ;;  %v1767_v13 = vadd.f32 -1.4531521, %v1751_v46  ;;  %v1689_v24 = vand.u32 2147483647, %v4599_v40  ;;  %v1394_v30 = vadd.f32 %v4552_v48, %v1378_v9 }
 0x254   : > { %v2005_v15 = vadd.f32 1.0, %v1989_v6  ;;  %v1782_v36 = vmul.f32 %v2806_v31, %v1766_v62  ;;  %2809 = vpow2.f32 %v1936_v2  ;;  %v1704_v56 = vmul.f32 0.3275911, %v1688_v35 }
 0x255   : > { %v1783_v45 = vmul.f32 %v2808_v26, %v1767_v13  ;;  %2811 = vpow2.f32 %v1938_v50  ;;  %v1705_v61 = vmul.f32 0.3275911, %v1689_v24  ;;  %v2020_v25 = vmul.f32 %v2004_v5, %v1620_v34 }
 0x256   : > { %v2021_v23 = vmul.f32 %v2005_v15, %v1621_v8  ;;  %v1798_v53 = vadd.f32 1.4214138, %v1782_v36  ;;  %v1720_v47 = vadd.f32 1.0, %v1704_v56  ;;  %v1395_v20 = vadd.f32 %v4552_v48, %v1379_v11 }
 0x257   : > { %v1799_v19 = vadd.f32 1.4214138, %v1783_v45  ;;  %v1721_v0 = vadd.f32 1.0, %v1705_v61  ;;  %v1502_v54 = vadd.f32 %v1486_v16, %v1394_v30  ;;  %v1896_v3 = vsub.f32 0.0, %v1688_v35 }
 0x258   : > { %v2032_v22 = vpack.c.bf16 %v2021_v23, %v2020_v25  ;;  %v1814_v21 = vmul.f32 %v2806_v31, %v1798_v53  ;;  %2813 = vrcp.f32 %v1720_v47  ;;  %v1503_v43 = vadd.f32 %v1487_v29, %v1395_v20 }
 0x259   : > { %v1815_v51 = vmul.f32 %v2808_v26, %v1799_v19  ;;  %2815 = vrcp.f32 %v1721_v0  ;;  %v4607_v14 = vadd.f32 %v1594_v38, %v1502_v54  ;;  %v1897_v58 = vsub.f32 0.0, %v1689_v24 }
 0x25a   : > { %2591 = vmatprep.mubr.bf16.mxu1 %v2032_v22  ;;  %v1830_v32 = vadd.f32 -0.28449672, %v1814_v21  ;;  %v4610_v9 = vadd.f32 %v4997_v27, %v1503_v43  ;;  %vm1654_vm1 = vcmp.ge.f32.partialorder %v4524_v42, 0.0  ;;  %vm1655_vm2 = vcmp.ge.f32.partialorder %v4527_v7, 0.0 }
 0x25b   : > { %v1831_v4 = vadd.f32 -0.28449672, %v1815_v51  ;;  %v4613_v10 = vmul.f32 0.70710677, %v4607_v14  ;;  %v1912_v16 = vmul.f32 %v1896_v3, %v1688_v35  ;;  %v1913_v8 = vmul.f32 %v1897_v58, %v1689_v24 }
 0x25c   : > { %v1846_v63 = vmul.f32 %v2806_v31, %v1830_v32  ;;  %v4616_v11 = vmul.f32 0.70710677, %v4610_v9  ;;  %v1671_v35 = vsel %vm1655_vm2, 1.0, %v4952_v55  ;;  %v1622_v61 = vmul.f32 0.5, %v4504_v44 }
 0x25d   : > { %v1847_v48 = vmul.f32 %v2808_v26, %v1831_v4  ;;  %v1690_v29 = vand.u32 2147483647, %v4613_v10  ;;  %v1940_v36 = vmul.f32 1.442695, %v1912_v16  ;;  %v1942_v45 = vmul.f32 1.442695, %v1913_v8 }
 0x25e   : > { %v2810_v12 = vpop.eup %2809  ;;  %v1862_v17 = vadd.f32 0.2548296, %v1846_v63  ;;  %v1691_v57 = vand.u32 2147483647, %v4616_v11  ;;  %v1623_v42 = vmul.f32 0.5, %v4513_v41  ;;  %vm1656_vm3 = vcmp.ge.f32.partialorder %v4596_v28, 0.0 }
 0x25f   : > { %v2812_v59 = vpop.eup %2811  ;;  %v1863_v52 = vadd.f32 0.2548296, %v1847_v48  ;;  %v1706_v39 = vmul.f32 0.3275911, %v1690_v29  ;;  %v1898_v20 = vsub.f32 0.0, %v1690_v29  ;;  %vm1657_vm4 = vcmp.ge.f32.partialorder %v4599_v40, 0.0 }
 0x260   : > { %v1878_v38 = vmul.f32 %v2806_v31, %v1862_v17  ;;  %v1707_v2 = vmul.f32 0.3275911, %v1691_v57  ;;  %v1670_v31 = vsel %vm1654_vm1, 1.0, %v4952_v55  ;;  %v1899_v22 = vsub.f32 0.0, %v1691_v57 }
 0x261   : > { %v1879_v33 = vmul.f32 %v2808_v26, %v1863_v52  ;;  %v1722_v49 = vadd.f32 1.0, %v1706_v39  ;;  %v1914_v44 = vmul.f32 %v1898_v20, %v1690_v29  ;;  %v1624_v40 = vmul.f32 0.5, %v4580_v37 }
 0x262   : > { %v2814_v1 = vpop.eup %2813  ;;  %v1958_v18 = vmul.f32 %v2810_v12, %v1878_v38  ;;  %v1723_v6 = vadd.f32 1.0, %v1707_v2  ;;  %v1915_v48 = vmul.f32 %v1899_v22, %v1691_v57  ;;  %vm1658_vm5 = vcmp.ge.f32.partialorder %v4613_v10, 0.0 }
 0x263   : > { %v2816_v46 = vpop.eup %2815  ;;  %v1959_v50 = vmul.f32 %v2812_v59, %v1879_v33  ;;  %v1752_v34 = vmul.f32 1.0614054, %v2814_v1  ;;  %2817 = vrcp.f32 %v1722_v49  ;;  %v1944_v38 = vmul.f32 1.442695, %v1914_v44 }
 0x264   : > { %v1974_v62 = vsub.f32 1.0, %v1958_v18  ;;  %v1753_v5 = vmul.f32 1.0614054, %v2816_v46  ;;  %2819 = vrcp.f32 %v1723_v6  ;;  %v1946_v2 = vmul.f32 1.442695, %v1915_v48 }
 0x265   : > { %v1975_v26 = vsub.f32 1.0, %v1959_v50  ;;  %v1768_v13 = vadd.f32 -1.4531521, %v1752_v34  ;;  %2821 = vpow2.f32 %v1940_v36  ;;  %v1625_v36 = vmul.f32 0.5, %v4582_v60 }
 0x266   : > { %v1990_v30 = vmul.f32 %v1974_v62, %v1670_v31  ;;  %v1769_v15 = vadd.f32 -1.4531521, %v1753_v5  ;;  %2823 = vpow2.f32 %v1942_v45  ;;  %vm1659_vm6 = vcmp.ge.f32.partialorder %v4616_v11, 0.0 }
 0x267   : > { %v1991_v56 = vmul.f32 %v1975_v26, %v1671_v35  ;;  %v1784_v24 = vmul.f32 %v2814_v1, %v1768_v13  ;;  %2825 = vpow2.f32 %v1944_v38  ;;  %v1675_v22 = vsel %vm1659_vm6, 1.0, %v4952_v55 }
 0x268   : > { %v2006_v25 = vadd.f32 1.0, %v1990_v30  ;;  %v1785_v23 = vmul.f32 %v2816_v46, %v1769_v15  ;;  %2827 = vpow2.f32 %v1946_v2  ;;  %v1627_v10 = vmul.f32 0.5, %v4610_v9 }
 0x269   : > { %v2007_v53 = vadd.f32 1.0, %v1991_v56  ;;  %v1800_v47 = vadd.f32 1.4214138, %v1784_v24 }
 0x26a   : > { %v2022_v19 = vmul.f32 %v2006_v25, %v1622_v61  ;;  %v1801_v0 = vadd.f32 1.4214138, %v1785_v23 }
 0x26b   : > { %v2023_v7 = vmul.f32 %v2007_v53, %v1623_v42  ;;  %v1816_v54 = vmul.f32 %v2814_v1, %v1800_v47 }
 0x26c   : > { %v1817_v21 = vmul.f32 %v2816_v46, %v1801_v0 }
 0x26d   : > { %v2033_v51 = vpack.c.bf16 %v2023_v7, %v2022_v19  ;;  %v1832_v43 = vadd.f32 -0.28449672, %v1816_v54  ;;  %v2818_v32 = vpop.eup %2817  ;;  %v1674_v7 = vsel %vm1658_vm5, 1.0, %v4952_v55 }
 0x26e   : > { %v1833_v4 = vadd.f32 -0.28449672, %v1817_v21  ;;  %v2820_v27 = vpop.eup %2819  ;;  %v1754_v41 = vmul.f32 1.0614054, %v2818_v32 }
 0x26f   : > { %2592 = vmatmul.mubr.bf16.gmra.mrb[12].mxu1 %v2033_v51  ;;  %v1848_v63 = vmul.f32 %v2814_v1, %v1832_v43  ;;  %v1755_v17 = vmul.f32 1.0614054, %v2820_v27  ;;  %v2822_v18 = vpop.eup %2821  ;;  %v1626_v43 = vmul.f32 0.5, %v4607_v14 }
 0x270   : > { %v1849_v12 = vmul.f32 %v2816_v46, %v1833_v4  ;;  %v1770_v59 = vadd.f32 -1.4531521, %v1754_v41  ;;  %v2824_v50 = vpop.eup %2823 }
 0x271   : > { %v1864_v3 = vadd.f32 0.2548296, %v1848_v63  ;;  %v1771_v58 = vadd.f32 -1.4531521, %v1755_v17  ;;  %v2826_v53 = vpop.eup %2825  ;;  %v2423_v63 = vld [vmem:[%s4999_s12] ss:$0 sm:$0xff] }
 0x272   : > { %v1865_v52 = vadd.f32 0.2548296, %v1849_v12  ;;  %v1786_v33 = vmul.f32 %v2818_v32, %v1770_v59  ;;  %v2828_v0 = vpop.eup %2827  ;;  %s3085_s12 = smov [#allocation10]  }
 0x273   : > { %v1880_v39 = vmul.f32 %v2814_v1, %v1864_v3  ;;  %v1787_v49 = vmul.f32 %v2820_v27, %v1771_v58  ;;  %v1672_v1 = vsel %vm1656_vm3, 1.0, %v4952_v55  ;;  %s2948_s4 = sshll.u32 %s3085_s12, 4  ;;  %s2949_s4 = int_to_ptr.vmem [resolvable:$false] %s2948_s4 }
 0x274   : > { %v1881_v16 = vmul.f32 %v2816_v46, %v1865_v52  ;;  %v1802_v34 = vadd.f32 1.4214138, %v1786_v33  ;;  %v1673_v46 = vsel %vm1657_vm4, 1.0, %v4952_v55  ;;  %s2950_s24 = scalar_lea.vmem %s2949_s4, 4096  ;;  %p2951_p4 = scmp.lt.s32.totalorder %s4671_s20, %s2949_s4 }
 0x275   : > { %v1960_v29 = vmul.f32 %v2822_v18, %v1880_v39  ;;  %v1803_v8 = vadd.f32 1.4214138, %v1787_v49  ;;  %p2952_p7 = scmp.lt.s32.totalorder %s2950_s24, %s2944_s8 }
 0x276   : > { %v1961_v57 = vmul.f32 %v2824_v50, %v1881_v16  ;;  %v1818_v62 = vmul.f32 %v2818_v32, %v1802_v34 }
 0x277   : > { %v1976_v6 = vsub.f32 1.0, %v1960_v29  ;;  %v1819_v31 = vmul.f32 %v2820_v27, %v1803_v8  ;;  %p2953_p3 = por %p2952_p7, %p2951_p4 }
 0x278   : > { %v1977_v5 = vsub.f32 1.0, %v1961_v57  ;;  %v1834_v13 = vadd.f32 -0.28449672, %v1818_v62 }
 0x279   : > { %v1992_v26 = vmul.f32 %v1976_v6, %v1672_v1  ;;  %v1835_v28 = vadd.f32 -0.28449672, %v1819_v31  ;;  %p2954_p0 = pnand %p2953_p3, %p2947_p12 }
 0x27a   : > { %v1993_v35 = vmul.f32 %v1977_v5, %v1673_v46  ;;  %v1850_v15 = vmul.f32 %v2818_v32, %v1834_v13 }
 0x27b   : > { %v2008_v30 = vadd.f32 1.0, %v1992_v26  ;;  %v1851_v24 = vmul.f32 %v2820_v27, %v1835_v28 }
 0x27c   : > { %v2009_v56 = vadd.f32 1.0, %v1993_v35  ;;  %v1866_v45 = vadd.f32 0.2548296, %v1850_v15 }
 0x27d   : > { %v2024_v61 = vmul.f32 %v2008_v30, %v1624_v40  ;;  %v1867_v23 = vadd.f32 0.2548296, %v1851_v24 }
 0x27e   : > { %v2025_v25 = vmul.f32 %v2009_v56, %v1625_v36  ;;  %v1882_v42 = vmul.f32 %v2818_v32, %v1866_v45 }
 0x27f   : > { %v1883_v19 = vmul.f32 %v2820_v27, %v1867_v23 }
 0x280   : > { %v2034_v47 = vpack.c.bf16 %v2025_v25, %v2024_v61  ;;  %v1962_v20 = vmul.f32 %v2826_v53, %v1882_v42 }
 0x281   : > { %v1963_v37 = vmul.f32 %v2828_v0, %v1883_v19 }
 0x282   : > { %2595 = vmatprep.mubr.bf16.mxu1 %v2034_v47  ;;  %v1978_v60 = vsub.f32 1.0, %v1962_v20 }
 0x283   : > { %v1979_v54 = vsub.f32 1.0, %v1963_v37 }
 0x284   : > { %v1994_v21 = vmul.f32 %v1978_v60, %v1674_v7 }
 0x285   : > { %v1995_v51 = vmul.f32 %v1979_v54, %v1675_v22 }
 0x286   : > { %v2010_v32 = vadd.f32 1.0, %v1994_v21 }
 0x287   : > { %v2011_v4 = vadd.f32 1.0, %v1995_v51 }
 0x288   : > { %v2026_v44 = vmul.f32 %v2010_v32, %v1626_v43 }
 0x289   : > { %v2027_v27 = vmul.f32 %v2011_v4, %v1627_v10 }
 0x28b   : > { %v2035_v11 = vpack.c.bf16 %v2027_v27, %v2026_v44 }
 0x28d   : > { %2596 = vmatmul.mubr.bf16.gmra.mrb[16].mxu1 %v2035_v11 }
 0x2ef   : > { %v2585_v55 = vpop.f32.mrb[4].mxu1 }
 0x2f0   : > { %v2150_v41 = vadd.f32 %v2585_v55, %v2423_v63  ;;  %v2141_v48 = vpop.f32.mrb[5].mxu1 }
 0x2f1   : > { %v2142_v12 = vadd.f32 %v2423_v63, %v2141_v48  ;;  %v2586_v14 = vpop.f32.mrb[6].mxu1 }
 0x2f2   : > { %2206 = vst [vmem:[%s4648_s21 + $0x10] sm:$0xff] %v2150_v41  ;;  %v2153_v9 = vadd.f32 %v2586_v14, %v2423_v63  ;;  %v2144_v17 = vpop.f32.mrb[7].mxu1 }
 0x2f3   : > { %2204 = vst [vmem:[%s4648_s21] sm:$0xff] %v2142_v12  ;;  %v2145_v3 = vadd.f32 %v2423_v63, %v2144_v17 }
 0x2f4   : > { %2207 = vst [vmem:[%s4648_s21 + $0x18] sm:$0xff] %v2153_v9 }
 0x2f5   : > { %2205 = vst [vmem:[%s4648_s21 + $0x8] sm:$0xff] %v2145_v3 }
 0x318   : > { %v2589_v59 = vpop.f32.mrb[8].mxu1 }
 0x319   : > { %v2166_v52 = vadd.f32 %v2589_v59, %v2423_v63  ;;  %v2157_v58 = vpop.f32.mrb[9].mxu1 }
 0x31a   : > { %v2158_v38 = vadd.f32 %v2423_v63, %v2157_v58  ;;  %v2590_v39 = vpop.f32.mrb[10].mxu1 }
 0x31b   : > { %2210 = vst [vmem:[%s4648_s21 + $0x30] sm:$0xff] %v2166_v52  ;;  %v2169_v33 = vadd.f32 %v2590_v39, %v2423_v63  ;;  %v2160_v2 = vpop.f32.mrb[11].mxu1 }
 0x31c   : > { %2208 = vst [vmem:[%s4648_s21 + $0x20] sm:$0xff] %v2158_v38  ;;  %v2161_v18 = vadd.f32 %v2423_v63, %v2160_v2 }
 0x31d   : > { %2211 = vst [vmem:[%s4648_s21 + $0x38] sm:$0xff] %v2169_v33 }
 0x31e   : > { %2209 = vst [vmem:[%s4648_s21 + $0x28] sm:$0xff] %v2161_v18 }
 0x342   : > { %v2593_v16 = vpop.f32.mrb[12].mxu1 }
 0x343   : > { %v2182_v49 = vadd.f32 %v2593_v16, %v2423_v63  ;;  %v2173_v50 = vpop.f32.mrb[13].mxu1 }
 0x344   : > { %v2174_v29 = vadd.f32 %v2423_v63, %v2173_v50  ;;  %v2594_v34 = vpop.f32.mrb[14].mxu1 }
 0x345   : > { %2214 = vst [vmem:[%s4648_s21 + $0x50] sm:$0xff] %v2182_v49  ;;  %v2185_v57 = vadd.f32 %v2594_v34, %v2423_v63  ;;  %v2176_v8 = vpop.f32.mrb[15].mxu1 }
 0x346   : > { %2212 = vst [vmem:[%s4648_s21 + $0x40] sm:$0xff] %v2174_v29  ;;  %v2177_v6 = vadd.f32 %v2423_v63, %v2176_v8 }
 0x347   : > { %2215 = vst [vmem:[%s4648_s21 + $0x58] sm:$0xff] %v2185_v57 }
 0x348   : > { %2213 = vst [vmem:[%s4648_s21 + $0x48] sm:$0xff] %v2177_v6 }
 0x360   : > { %v2597_v62 = vpop.f32.mrb[16].mxu1 }
 0x361   : > { %v2198_v1 = vadd.f32 %v2597_v62, %v2423_v63  ;;  %v2189_v5 = vpop.f32.mrb[17].mxu1 }
 0x362   : > { %v2190_v31 = vadd.f32 %v2423_v63, %v2189_v5  ;;  %v2598_v46 = vpop.f32.mrb[18].mxu1 }
 0x363   : > { %2218 = vst [vmem:[%s4648_s21 + $0x70] sm:$0xff] %v2198_v1  ;;  %v2201_v26 = vadd.f32 %v2598_v46, %v2423_v63  ;;  %v2192_v13 = vpop.f32.mrb[19].mxu1 }
 0x364   : > { %2216 = vst [vmem:[%s4648_s21 + $0x60] sm:$0xff] %v2190_v31  ;;  %v2193_v35 = vadd.f32 %v2423_v63, %v2192_v13 }
 0x365   : > { %2219 = vst [vmem:[%s4648_s21 + $0x78] sm:$0xff] %v2201_v26 }
 0x366   : > { %2217 = vst [vmem:[%s4648_s21 + $0x68] sm:$0xff] %v2193_v35 }
 0x367   : > { %2957 = shalt.err (!%p2954_p0)
}
 0x368   : > { %s2958_s15 = scalar_lea.hbm %s4669_s30, 2048  ;;  %s2962_s1 = scalar_lea.hbm %s5002_s6, 8192 }
 0x369   : > { %p2959_p1 = scmp.ne.s32.totalorder %s4669_s30, %s2958_s15  ;;  %p2963_p2 = scmp.lt.u32.totalorder %s4669_s30, %s5002_s6 }
 0x36a   : > { %p2964_p9 = scmp.lt.u32.totalorder %s2962_s1, %s2958_s15  ;;  %p2966_p13 = scmp.lt.u32.totalorder %s2958_s15, %s4669_s30 }
 0x36b   : > { %p2960_p11 = pnand %p2959_p1, %p5003_p6 }
 0x36c   : > { %p2965_p5 = por %p2964_p9, %p2963_p2 }
 0x36d   : > { %p2961_p10 = pneg %p2960_p11 }
 0x36e   : > { %p2967_p8 = por %p2966_p13, %p2965_p5 }
 0x370   : > { %p2968_p12 = pnand %p2967_p8, %p2961_p10 }
 0x372   : > { %2971 = shalt.err (!%p2968_p12)
}
 0x373   : > { %s3086_s16 = smov 128   ;;  %s3087_s19 = smov 8  }
 0x374   : > { %2613 = dma.vmem_to_hbm [thread:$0]  (%p5003_p6), %s4671_s20, 2048, %s4669_s30, %s4678_s25, %s3086_s16, %s3086_s16, %s3087_s19  }
 0x375 PF: > { %s5004_s8 = sld [smem:[#allocation15_spill]]  ;;  %s5005_s12 = sld [smem:[#allocation19_spill]] }
 0x376   : > { %p2640_p4 = scmp.ge.s32.totalorder %s3074_s11, 2 }
 0x37b   : > { %s2252_s4 = sand.u32 1, %s5004_s8   ;;  %p5006_p7 = scmp.ne.s32.totalorder %s5005_s12, 0 }
 0x37c   : > { %s2253_s24 = scalar_lea.sflag [#allocation4], %s2252_s4 }
 0x37d   : > { %p2630_p3 = pnand %p2640_p4, %p5006_p7 }
 0x37f   : > { %3029 = dma.done.wait (!%p2630_p3), %s2253_s24, 2048  }
 0x380   : > { %3031 = vsyncadd (!%p2630_p3), %s2253_s24, 4294965248  ;;  %s25_s11 = sadd.s32 1, %s3074_s11   ;;  %s5007_s24 = sld [smem:[#allocation16_spill]] }
 0x381   : > { %p22_p0 = scmp.ge.s32.totalorder %s25_s11, 6   ;;  %s5008_s25 = smov %s3042_s26 }
 0x382   : > { %s5009_s26 = smov %s3335_s27  ;;  %s5010_s27 = smov %s3050_s28 }
 0x383   : > { %s5011_s28 = smov %s3054_s29  ;;  %s5012_s29 = smov %s3330_s7 }
 0x384   : > { %s5013_s30 = smov %s3066_s9  ;;  %s5014_s8 = smov %s3070_s10 }
 0x385   : > { %s5015_s9 = smov %s5018_s17  ;;  %s5016_s10 = smov %s5022_s22 }
 0x386   :  { %24 = sbr.rel (!%p22_p0) target bundleno = 17 (0x11), region = 108 }
 0x38d   :  { %2258 = vsyncpa [#allocation3], 1 }
 0x38e   :  { %2260 = vsyncpa [#allocation3 + $0x1], 1 }
 0x38f   :  { %2261 = vsyncpa [#allocation6], 1 }
 0x390   :  { %2262 = vsyncpa [#allocation9], 1 }
 0x391   :  { %2263 = vsyncpa [#allocation4], 1 }
 0x392   :  { %2265 = vsyncpa [#allocation4 + $0x1], 1 }

</bundles_post_ra>
